<compile_context>
chip_gen: v6e
topology: v6e:2x2x1
jax: 0.10.0
libtpu: 0.0.40
codegen_flags: <defaults>
</compile_context>

<pallas_src>
import jax
import jax.numpy as jnp
from jax import lax
from jax.experimental import pallas as pl
from jax.experimental.pallas import tpu as pltpu

# Model hyper-parameters (small, consistent with the module's forward).
S = 8            # sequence length
B = 2            # batch size
E = 32           # d_model
NHEAD = 4        # number of attention heads
HD = E // NHEAD  # head dim
FF = 64          # dim_feedforward
NUM_LAYERS = 2
EPS = 1e-5       # default LayerNorm eps in nn.TransformerEncoderLayer
NB = B * S       # total number of tokens
SLAB_W = 128     # packed-slab lane width (full (8,128) tiles, unmasked DMA)

# Per-layer row offsets inside the packed parameter slab.
ROW_WIN = 0                  # (E, 3E)  pre-transposed QKV weight (Q cols scaled)
ROW_WO = ROW_WIN + E         # (E, E)   pre-transposed out-proj weight
ROW_W1 = ROW_WO + E          # (E, FF)  pre-transposed FFN weight 1
ROW_W2 = ROW_W1 + E          # (FF, E)  pre-transposed FFN weight 2
ROW_BQKV = ROW_W2 + FF       # (NB, 3E) pre-broadcast QKV bias (Q part scaled)
ROW_BO = ROW_BQKV + NB       # (NB, E)  pre-broadcast out-proj bias
ROW_BF1 = ROW_BO + NB        # (NB, FF)
ROW_BF2 = ROW_BF1 + NB       # (NB, E)
ROW_G1 = ROW_BF2 + NB        # (NB, E)  LayerNorm1 gamma
ROW_BE1 = ROW_G1 + NB        # (NB, E)  LayerNorm1 beta
ROW_G2 = ROW_BE1 + NB        # (NB, E)  LayerNorm2 gamma
ROW_BE2 = ROW_G2 + NB        # (NB, E)  LayerNorm2 beta
ROW_MASK = ROW_BE2 + NB      # (NB, NB) block-diagonal batch mask (0/1)
SLAB_ROWS = ROW_MASK + NB    # 304 rows per layer (multiple of 8)

_NT = (((1,), (1,)), ((), ()))   # contract last dims of both operands (A @ B.T)


def _mm(a, b):
    return jnp.dot(a, b, preferred_element_type=jnp.float32)


def _mm_nt(a, b):
    return lax.dot_general(a, b, _NT, preferred_element_type=jnp.float32)


def _layernorm(x, gamma, beta):
    mu = jnp.mean(x, axis=-1, keepdims=True)
    var = jnp.mean((x - mu) ** 2, axis=-1, keepdims=True)
    return (x - mu) * jax.lax.rsqrt(var + EPS) * gamma + beta


def encoder_kernel(x_ref, slab_ref, out_ref):
    """All NUM_LAYERS post-norm encoder layers for the whole (B*S, E) batch."""
    x = x_ref[...].astype(jnp.float32)                       # (NB, E)
    # Block-diagonal batch mask, built at pack time, loaded once (layer 0 copy).
    bmask = slab_ref[0, ROW_MASK:ROW_MASK + NB, 0:NB]        # (NB, NB) 0/1

    for l in range(NUM_LAYERS):                              # static unroll
        # Zero-cost static ref windows -> plain sub-tile vlds.
        win_t = slab_ref[l, ROW_WIN:ROW_WIN + E, 0:3 * E]    # (E, 3E)
        w1_t = slab_ref[l, ROW_W1:ROW_W1 + E, 0:FF]          # (E, FF)
        w2_t = slab_ref[l, ROW_W2:ROW_W2 + FF, 0:E]          # (FF, E)
        b_qkv = slab_ref[l, ROW_BQKV:ROW_BQKV + NB, 0:3 * E]  # (NB, 3E)
        b_o = slab_ref[l, ROW_BO:ROW_BO + NB, 0:E]
        b_f1 = slab_ref[l, ROW_BF1:ROW_BF1 + NB, 0:FF]
        b_f2 = slab_ref[l, ROW_BF2:ROW_BF2 + NB, 0:E]
        g1 = slab_ref[l, ROW_G1:ROW_G1 + NB, 0:E]
        be1 = slab_ref[l, ROW_BE1:ROW_BE1 + NB, 0:E]
        g2 = slab_ref[l, ROW_G2:ROW_G2 + NB, 0:E]
        be2 = slab_ref[l, ROW_BE2:ROW_BE2 + NB, 0:E]

        # ---- fused QKV projection (Q weight/bias pre-scaled by 1/sqrt(HD)) ----
        qkv = _mm(x, win_t) + b_qkv                          # (NB, 3E)

        # ---- self-attention: one (NB,NB) masked score matrix per head ----
        attn = b_o                                           # accumulate o-proj + bias
        for h in range(NHEAD):                               # static unroll
            c = h * HD
            q_h = qkv[:, c:c + HD]                           # (NB, HD)
            k_h = qkv[:, E + c:E + c + HD]                   # (NB, HD)
            v_h = qkv[:, 2 * E + c:2 * E + c + HD]           # (NB, HD)
            s = _mm_nt(q_h, k_h)                             # (NB, NB), no kh.T
            s = s - jnp.max(s, axis=-1, keepdims=True)
            p = jnp.exp(s) * bmask                           # zero cross-batch terms
            d = jnp.sum(p, axis=-1, keepdims=True)
            r = pl.reciprocal(d, approx=True)                # EUP slot
            r = r * (2.0 - d * r)                            # Newton step -> f32 accurate
            o_h = _mm(p * r, v_h)                            # (NB, HD)
            wo_h = slab_ref[l, ROW_WO + c:ROW_WO + c + HD, 0:E]   # (HD, E) ref slice
            attn = attn + _mm(o_h, wo_h)                     # no concatenates

        # ---- add & norm 1 ----
        x1 = _layernorm(x + attn, g1, be1)

        # ---- feed-forward (ReLU) + add & norm 2 ----
        h1 = jnp.maximum(_mm(x1, w1_t) + b_f1, 0.0)
        x = _layernorm(x1 + _mm(h1, w2_t) + b_f2, g2, be2)

    out_ref[...] = x.astype(out_ref.dtype)


def pack_params(layer_params):
    """Pre-transpose, pre-scale, pre-broadcast and pack all per-layer params
    (PyTorch layout) into ONE layer-stacked (NUM_LAYERS, SLAB_ROWS, 128) slab."""
    scale = 1.0 / (HD ** 0.5)

    def block(mat, nrows):
        m = jnp.asarray(mat, jnp.float32).reshape(nrows, -1)
        return jnp.pad(m, ((0, 0), (0, SLAB_W - m.shape[1])))

    def bcast(vec):                                  # (1,N)/(N,) -> (NB, N) rows
        v = jnp.asarray(vec, jnp.float32).reshape(1, -1)
        return block(jnp.broadcast_to(v, (NB, v.shape[1])), NB)

    # Block-diagonal batch mask (same for every layer; only layer 0 copy is read).
    bmask = jnp.kron(jnp.eye(B, dtype=jnp.float32), jnp.ones((S, S), jnp.float32))

    slabs = []
    for (wq, wk, wv, bq, bk, bv, wo, bo, g1, be1, g2, be2,
         w1, bf1, w2, bf2) in layer_params:
        win_t = jnp.concatenate([wq.T * scale, wk.T, wv.T], axis=1)      # (E, 3E)
        b_qkv = jnp.concatenate([bq.reshape(-1) * scale,
                                 bk.reshape(-1), bv.reshape(-1)])        # (3E,)
        rows = [
            block(win_t, E),          # ROW_WIN
            block(wo.T, E),           # ROW_WO  (rows h*HD:(h+1)*HD = head h)
            block(w1.T, E),           # ROW_W1
            block(w2.T, FF),          # ROW_W2
            bcast(b_qkv),             # ROW_BQKV
            bcast(bo), bcast(bf1), bcast(bf2),
            bcast(g1), bcast(be1), bcast(g2), bcast(be2),
            block(bmask, NB),         # ROW_MASK
        ]
        slab = jnp.concatenate(rows, axis=0)
        assert slab.shape == (SLAB_ROWS, SLAB_W)
        slabs.append(slab)
    return jnp.stack(slabs)           # (NUM_LAYERS, SLAB_ROWS, SLAB_W)


@jax.jit
def custom_transformer_encoder(src_sbe, slab):
    """CustomTransformerEncoder.forward with mask=None, src_key_padding_mask=None,
    per_layer_src_mask=False, enable_nested_tensor=False, norm=None (eval)."""
    # TODO(synk): src_mask / src_key_padding_mask are not implemented (the
    # reference forward is exercised with both set to None).
    x = jnp.transpose(src_sbe, (1, 0, 2)).reshape(NB, E)     # (S,B,E) -> (B*S,E)
    out = pl.pallas_call(
        encoder_kernel,
        out_shape=jax.ShapeDtypeStruct((NB, E), src_sbe.dtype),
        in_specs=[pl.BlockSpec(memory_space=pltpu.MemorySpace.VMEM),
                  pl.BlockSpec(memory_space=pltpu.MemorySpace.VMEM)],
        out_specs=pl.BlockSpec(memory_space=pltpu.MemorySpace.VMEM),
    )(x, slab)
    return out.reshape(B, S, E).transpose(1, 0, 2)           # back to (S, B, E)


# ---------------- pure-JAX reference (for a correctness check) ----------------
def _ref_layer(x_bse, params):
    (wq, wk, wv, bq, bk, bv, wo, bo, g1, be1, g2, be2, w1, bf1, w2, bf2) = params
    x = x_bse
    q = x @ wq.T + bq
    k = x @ wk.T + bk
    v = x @ wv.T + bv
    qh = q.reshape(B, S, NHEAD, HD).transpose(0, 2, 1, 3)
    kh = k.reshape(B, S, NHEAD, HD).transpose(0, 2, 1, 3)
    vh = v.reshape(B, S, NHEAD, HD).transpose(0, 2, 1, 3)
    s = jnp.einsum('bhqd,bhkd->bhqk', qh, kh) / (HD ** 0.5)
    p = jax.nn.softmax(s, axis=-1)
    o = jnp.einsum('bhqk,bhkd->bhqd', p, vh).transpose(0, 2, 1, 3).reshape(B, S, E)
    attn = o @ wo.T + bo
    x1 = _layernorm(x + attn, g1, be1)
    ff = jnp.maximum(x1 @ w1.T + bf1, 0.0) @ w2.T + bf2
    return _layernorm(x1 + ff, g2, be2)


def _ref_encoder(src_sbe, layer_params):
    x = jnp.transpose(src_sbe, (1, 0, 2))
    for params in layer_params:
        x = _ref_layer(x, params)
    return x.transpose(1, 0, 2)


# ---------------------------- parameter creation ------------------------------
def make_layer_params(key):
    ks = jax.random.split(key, 8)
    in_proj_w = jax.random.normal(ks[0], (3 * E, E), jnp.float32) * 0.05
    in_proj_b = jax.random.normal(ks[1], (3 * E,), jnp.float32) * 0.05
    wq, wk, wv = in_proj_w[:E], in_proj_w[E:2 * E], in_proj_w[2 * E:]
    bq, bk, bv = (in_proj_b[:E].reshape(1, E), in_proj_b[E:2 * E].reshape(1, E),
                  in_proj_b[2 * E:].reshape(1, E))
    wo = jax.random.normal(ks[2], (E, E), jnp.float32) * 0.05
    bo = (jax.random.normal(ks[3], (E,), jnp.float32) * 0.05).reshape(1, E)
    g1 = jnp.ones((1, E), jnp.float32)
    be1 = jnp.zeros((1, E), jnp.float32)
    g2 = jnp.ones((1, E), jnp.float32)
    be2 = jnp.zeros((1, E), jnp.float32)
    w1 = jax.random.normal(ks[4], (FF, E), jnp.float32) * 0.05
    bf1 = (jax.random.normal(ks[5], (FF,), jnp.float32) * 0.05).reshape(1, FF)
    w2 = jax.random.normal(ks[6], (E, FF), jnp.float32) * 0.05
    bf2 = (jax.random.normal(ks[7], (E,), jnp.float32) * 0.05).reshape(1, E)
    return (wq, wk, wv, bq, bk, bv, wo, bo, g1, be1, g2, be2, w1, bf1, w2, bf2)


if __name__ == "__main__":
    key = jax.random.PRNGKey(0)
    k_src, k_params = jax.random.split(key)
    src = jax.random.normal(k_src, (S, B, E), jnp.float32)   # (S, B, E) seq-first

    layer_keys = jax.random.split(k_params, NUM_LAYERS)
    layer_params = [make_layer_params(k) for k in layer_keys]
    slab = pack_params(layer_params)

    out = jax.block_until_ready(custom_transformer_encoder(src, slab))

    ref = jax.block_until_ready(_ref_encoder(src, layer_params))
    assert out.shape == (S, B, E)
    assert jnp.allclose(out, ref, rtol=1e-4, atol=1e-4), "mismatch vs reference"

    print("KERNEL_OK")
</pallas_src>

<mosaic_0001>
module attributes {stable_mosaic.version = 11 : i64} {
  func.func @encoder_kernel(%arg0: memref<16x32xf32, #tpu.memory_space<vmem>>, %arg1: memref<2x304x128xf32, #tpu.memory_space<vmem>>, %arg2: memref<16x32xf32, #tpu.memory_space<vmem>>) attributes {dimension_semantics = [], scalar_prefetch = 0 : i64, scratch_operands = 0 : i64, tpu.core_type = #tpu.core_type<tc>} {
    %c0 = arith.constant 0 : index
    %c0_0 = arith.constant 0 : index
    %0 = vector.load %arg0[%c0, %c0_0] : memref<16x32xf32, #tpu.memory_space<vmem>>, vector<16x32xf32>
    %c0_1 = arith.constant 0 : index
    %c288 = arith.constant 288 : index
    %c0_2 = arith.constant 0 : index
    %1 = vector.load %arg1[%c0_1, %c288, %c0_2] : memref<2x304x128xf32, #tpu.memory_space<vmem>>, vector<1x16x16xf32>
    %2 = vector.shape_cast %1 : vector<1x16x16xf32> to vector<16x16xf32>
    %c0_3 = arith.constant 0 : index
    %c0_4 = arith.constant 0 : index
    %c0_5 = arith.constant 0 : index
    %3 = vector.load %arg1[%c0_3, %c0_4, %c0_5] : memref<2x304x128xf32, #tpu.memory_space<vmem>>, vector<1x32x96xf32>
    %4 = vector.shape_cast %3 : vector<1x32x96xf32> to vector<32x96xf32>
    %c0_6 = arith.constant 0 : index
    %c64 = arith.constant 64 : index
    %c0_7 = arith.constant 0 : index
    %5 = vector.load %arg1[%c0_6, %c64, %c0_7] : memref<2x304x128xf32, #tpu.memory_space<vmem>>, vector<1x32x64xf32>
    %6 = vector.shape_cast %5 : vector<1x32x64xf32> to vector<32x64xf32>
    %c0_8 = arith.constant 0 : index
    %c96 = arith.constant 96 : index
    %c0_9 = arith.constant 0 : index
    %7 = vector.load %arg1[%c0_8, %c96, %c0_9] : memref<2x304x128xf32, #tpu.memory_space<vmem>>, vector<1x64x32xf32>
    %8 = vector.shape_cast %7 : vector<1x64x32xf32> to vector<64x32xf32>
    %c0_10 = arith.constant 0 : index
    %c160 = arith.constant 160 : index
    %c0_11 = arith.constant 0 : index
    %9 = vector.load %arg1[%c0_10, %c160, %c0_11] : memref<2x304x128xf32, #tpu.memory_space<vmem>>, vector<1x16x96xf32>
    %10 = vector.shape_cast %9 : vector<1x16x96xf32> to vector<16x96xf32>
    %c0_12 = arith.constant 0 : index
    %c176 = arith.constant 176 : index
    %c0_13 = arith.constant 0 : index
    %11 = vector.load %arg1[%c0_12, %c176, %c0_13] : memref<2x304x128xf32, #tpu.memory_space<vmem>>, vector<1x16x32xf32>
    %12 = vector.shape_cast %11 : vector<1x16x32xf32> to vector<16x32xf32>
    %c0_14 = arith.constant 0 : index
    %c192 = arith.constant 192 : index
    %c0_15 = arith.constant 0 : index
    %13 = vector.load %arg1[%c0_14, %c192, %c0_15] : memref<2x304x128xf32, #tpu.memory_space<vmem>>, vector<1x16x64xf32>
    %14 = vector.shape_cast %13 : vector<1x16x64xf32> to vector<16x64xf32>
    %c0_16 = arith.constant 0 : index
    %c208 = arith.constant 208 : index
    %c0_17 = arith.constant 0 : index
    %15 = vector.load %arg1[%c0_16, %c208, %c0_17] : memref<2x304x128xf32, #tpu.memory_space<vmem>>, vector<1x16x32xf32>
    %16 = vector.shape_cast %15 : vector<1x16x32xf32> to vector<16x32xf32>
    %c0_18 = arith.constant 0 : index
    %c224 = arith.constant 224 : index
    %c0_19 = arith.constant 0 : index
    %17 = vector.load %arg1[%c0_18, %c224, %c0_19] : memref<2x304x128xf32, #tpu.memory_space<vmem>>, vector<1x16x32xf32>
    %18 = vector.shape_cast %17 : vector<1x16x32xf32> to vector<16x32xf32>
    %c0_20 = arith.constant 0 : index
    %c240 = arith.constant 240 : index
    %c0_21 = arith.constant 0 : index
    %19 = vector.load %arg1[%c0_20, %c240, %c0_21] : memref<2x304x128xf32, #tpu.memory_space<vmem>>, vector<1x16x32xf32>
    %20 = vector.shape_cast %19 : vector<1x16x32xf32> to vector<16x32xf32>
    %c0_22 = arith.constant 0 : index
    %c256 = arith.constant 256 : index
    %c0_23 = arith.constant 0 : index
    %21 = vector.load %arg1[%c0_22, %c256, %c0_23] : memref<2x304x128xf32, #tpu.memory_space<vmem>>, vector<1x16x32xf32>
    %22 = vector.shape_cast %21 : vector<1x16x32xf32> to vector<16x32xf32>
    %c0_24 = arith.constant 0 : index
    %c272 = arith.constant 272 : index
    %c0_25 = arith.constant 0 : index
    %23 = vector.load %arg1[%c0_24, %c272, %c0_25] : memref<2x304x128xf32, #tpu.memory_space<vmem>>, vector<1x16x32xf32>
    %24 = vector.shape_cast %23 : vector<1x16x32xf32> to vector<16x32xf32>
    %cst = arith.constant dense<0.000000e+00> : vector<16x96xf32>
    %25 = tpu.matmul %0, %4, %cst {dimension_numbers = #tpu.dot_dimension_numbers<[1], [0], [0], [1], [0, 0, 1, 1], [], []>} : vector<16x32xf32>, vector<32x96xf32>, vector<16x96xf32> -> vector<16x96xf32>
    %26 = arith.addf %25, %10 : vector<16x96xf32>
    %27 = vector.extract_strided_slice %26 {offsets = [0, 0], sizes = [16, 8], strides = [1, 1]} : vector<16x96xf32> to vector<16x8xf32>
    %28 = vector.extract_strided_slice %26 {offsets = [0, 32], sizes = [16, 8], strides = [1, 1]} : vector<16x96xf32> to vector<16x8xf32>
    %29 = vector.extract_strided_slice %26 {offsets = [0, 64], sizes = [16, 8], strides = [1, 1]} : vector<16x96xf32> to vector<16x8xf32>
    %cst_26 = arith.constant dense<0.000000e+00> : vector<16x16xf32>
    %30 = tpu.matmul %27, %28, %cst_26 {dimension_numbers = #tpu.dot_dimension_numbers<[1], [1], [0], [0], [0, 0, 1, 0], [], []>} : vector<16x8xf32>, vector<16x8xf32>, vector<16x16xf32> -> vector<16x16xf32>
    %cst_27 = arith.constant dense<0xFF800000> : vector<16xf32>
    %31 = vector.multi_reduction <maximumf>, %30, %cst_27 [1] : vector<16x16xf32> to vector<16xf32>
    %32 = vector.shape_cast %31 : vector<16xf32> to vector<16x1xf32>
    %33 = vector.broadcast %32 : vector<16x1xf32> to vector<16x16xf32>
    %34 = arith.subf %30, %33 : vector<16x16xf32>
    %35 = math.exp %34 : vector<16x16xf32>
    %36 = arith.mulf %35, %2 : vector<16x16xf32>
    %cst_28 = arith.constant dense<0.000000e+00> : vector<16xf32>
    %37 = vector.multi_reduction <add>, %36, %cst_28 [1] : vector<16x16xf32> to vector<16xf32>
    %38 = vector.shape_cast %37 : vector<16xf32> to vector<16x1xf32>
    %39 = tpu.reciprocal %38 {approx = true} : vector<16x1xf32> -> vector<16x1xf32>
    %40 = arith.mulf %38, %39 : vector<16x1xf32>
    %cst_29 = arith.constant 2.000000e+00 : f32
    %41 = vector.broadcast %cst_29 : f32 to vector<16x1xf32>
    %42 = arith.subf %41, %40 : vector<16x1xf32>
    %43 = arith.mulf %39, %42 : vector<16x1xf32>
    %44 = vector.broadcast %43 : vector<16x1xf32> to vector<16x16xf32>
    %45 = arith.mulf %36, %44 : vector<16x16xf32>
    %cst_30 = arith.constant dense<0.000000e+00> : vector<16x8xf32>
    %46 = tpu.matmul %45, %29, %cst_30 {dimension_numbers = #tpu.dot_dimension_numbers<[1], [0], [0], [1], [0, 0, 1, 1], [], []>} : vector<16x16xf32>, vector<16x8xf32>, vector<16x8xf32> -> vector<16x8xf32>
    %c0_31 = arith.constant 0 : index
    %c32 = arith.constant 32 : index
    %c0_32 = arith.constant 0 : index
    %47 = vector.load %arg1[%c0_31, %c32, %c0_32] : memref<2x304x128xf32, #tpu.memory_space<vmem>>, vector<1x8x32xf32>
    %48 = vector.shape_cast %47 : vector<1x8x32xf32> to vector<8x32xf32>
    %cst_33 = arith.constant dense<0.000000e+00> : vector<16x32xf32>
    %49 = tpu.matmul %46, %48, %cst_33 {dimension_numbers = #tpu.dot_dimension_numbers<[1], [0], [0], [1], [0, 0, 1, 1], [], []>} : vector<16x8xf32>, vector<8x32xf32>, vector<16x32xf32> -> vector<16x32xf32>
    %50 = arith.addf %12, %49 : vector<16x32xf32>
    %51 = vector.extract_strided_slice %26 {offsets = [0, 8], sizes = [16, 8], strides = [1, 1]} : vector<16x96xf32> to vector<16x8xf32>
    %52 = vector.extract_strided_slice %26 {offsets = [0, 40], sizes = [16, 8], strides = [1, 1]} : vector<16x96xf32> to vector<16x8xf32>
    %53 = vector.extract_strided_slice %26 {offsets = [0, 72], sizes = [16, 8], strides = [1, 1]} : vector<16x96xf32> to vector<16x8xf32>
    %cst_34 = arith.constant dense<0.000000e+00> : vector<16x16xf32>
    %54 = tpu.matmul %51, %52, %cst_34 {dimension_numbers = #tpu.dot_dimension_numbers<[1], [1], [0], [0], [0, 0, 1, 0], [], []>} : vector<16x8xf32>, vector<16x8xf32>, vector<16x16xf32> -> vector<16x16xf32>
    %cst_35 = arith.constant dense<0xFF800000> : vector<16xf32>
    %55 = vector.multi_reduction <maximumf>, %54, %cst_35 [1] : vector<16x16xf32> to vector<16xf32>
    %56 = vector.shape_cast %55 : vector<16xf32> to vector<16x1xf32>
    %57 = vector.broadcast %56 : vector<16x1xf32> to vector<16x16xf32>
    %58 = arith.subf %54, %57 : vector<16x16xf32>
    %59 = math.exp %58 : vector<16x16xf32>
    %60 = arith.mulf %59, %2 : vector<16x16xf32>
    %cst_36 = arith.constant dense<0.000000e+00> : vector<16xf32>
    %61 = vector.multi_reduction <add>, %60, %cst_36 [1] : vector<16x16xf32> to vector<16xf32>
    %62 = vector.shape_cast %61 : vector<16xf32> to vector<16x1xf32>
    %63 = tpu.reciprocal %62 {approx = true} : vector<16x1xf32> -> vector<16x1xf32>
    %64 = arith.mulf %62, %63 : vector<16x1xf32>
    %cst_37 = arith.constant 2.000000e+00 : f32
    %65 = vector.broadcast %cst_37 : f32 to vector<16x1xf32>
    %66 = arith.subf %65, %64 : vector<16x1xf32>
    %67 = arith.mulf %63, %66 : vector<16x1xf32>
    %68 = vector.broadcast %67 : vector<16x1xf32> to vector<16x16xf32>
    %69 = arith.mulf %60, %68 : vector<16x16xf32>
    %cst_38 = arith.constant dense<0.000000e+00> : vector<16x8xf32>
    %70 = tpu.matmul %69, %53, %cst_38 {dimension_numbers = #tpu.dot_dimension_numbers<[1], [0], [0], [1], [0, 0, 1, 1], [], []>} : vector<16x16xf32>, vector<16x8xf32>, vector<16x8xf32> -> vector<16x8xf32>
    %c0_39 = arith.constant 0 : index
    %c40 = arith.constant 40 : index
    %c0_40 = arith.constant 0 : index
    %71 = vector.load %arg1[%c0_39, %c40, %c0_40] : memref<2x304x128xf32, #tpu.memory_space<vmem>>, vector<1x8x32xf32>
    %72 = vector.shape_cast %71 : vector<1x8x32xf32> to vector<8x32xf32>
    %cst_41 = arith.constant dense<0.000000e+00> : vector<16x32xf32>
    %73 = tpu.matmul %70, %72, %cst_41 {dimension_numbers = #tpu.dot_dimension_numbers<[1], [0], [0], [1], [0, 0, 1, 1], [], []>} : vector<16x8xf32>, vector<8x32xf32>, vector<16x32xf32> -> vector<16x32xf32>
    %74 = arith.addf %50, %73 : vector<16x32xf32>
    %75 = vector.extract_strided_slice %26 {offsets = [0, 16], sizes = [16, 8], strides = [1, 1]} : vector<16x96xf32> to vector<16x8xf32>
    %76 = vector.extract_strided_slice %26 {offsets = [0, 48], sizes = [16, 8], strides = [1, 1]} : vector<16x96xf32> to vector<16x8xf32>
    %77 = vector.extract_strided_slice %26 {offsets = [0, 80], sizes = [16, 8], strides = [1, 1]} : vector<16x96xf32> to vector<16x8xf32>
    %cst_42 = arith.constant dense<0.000000e+00> : vector<16x16xf32>
    %78 = tpu.matmul %75, %76, %cst_42 {dimension_numbers = #tpu.dot_dimension_numbers<[1], [1], [0], [0], [0, 0, 1, 0], [], []>} : vector<16x8xf32>, vector<16x8xf32>, vector<16x16xf32> -> vector<16x16xf32>
    %cst_43 = arith.constant dense<0xFF800000> : vector<16xf32>
    %79 = vector.multi_reduction <maximumf>, %78, %cst_43 [1] : vector<16x16xf32> to vector<16xf32>
    %80 = vector.shape_cast %79 : vector<16xf32> to vector<16x1xf32>
    %81 = vector.broadcast %80 : vector<16x1xf32> to vector<16x16xf32>
    %82 = arith.subf %78, %81 : vector<16x16xf32>
    %83 = math.exp %82 : vector<16x16xf32>
    %84 = arith.mulf %83, %2 : vector<16x16xf32>
    %cst_44 = arith.constant dense<0.000000e+00> : vector<16xf32>
    %85 = vector.multi_reduction <add>, %84, %cst_44 [1] : vector<16x16xf32> to vector<16xf32>
    %86 = vector.shape_cast %85 : vector<16xf32> to vector<16x1xf32>
    %87 = tpu.reciprocal %86 {approx = true} : vector<16x1xf32> -> vector<16x1xf32>
    %88 = arith.mulf %86, %87 : vector<16x1xf32>
    %cst_45 = arith.constant 2.000000e+00 : f32
    %89 = vector.broadcast %cst_45 : f32 to vector<16x1xf32>
    %90 = arith.subf %89, %88 : vector<16x1xf32>
    %91 = arith.mulf %87, %90 : vector<16x1xf32>
    %92 = vector.broadcast %91 : vector<16x1xf32> to vector<16x16xf32>
    %93 = arith.mulf %84, %92 : vector<16x16xf32>
    %cst_46 = arith.constant dense<0.000000e+00> : vector<16x8xf32>
    %94 = tpu.matmul %93, %77, %cst_46 {dimension_numbers = #tpu.dot_dimension_numbers<[1], [0], [0], [1], [0, 0, 1, 1], [], []>} : vector<16x16xf32>, vector<16x8xf32>, vector<16x8xf32> -> vector<16x8xf32>
    %c0_47 = arith.constant 0 : index
    %c48 = arith.constant 48 : index
    %c0_48 = arith.constant 0 : index
    %95 = vector.load %arg1[%c0_47, %c48, %c0_48] : memref<2x304x128xf32, #tpu.memory_space<vmem>>, vector<1x8x32xf32>
    %96 = vector.shape_cast %95 : vector<1x8x32xf32> to vector<8x32xf32>
    %cst_49 = arith.constant dense<0.000000e+00> : vector<16x32xf32>
    %97 = tpu.matmul %94, %96, %cst_49 {dimension_numbers = #tpu.dot_dimension_numbers<[1], [0], [0], [1], [0, 0, 1, 1], [], []>} : vector<16x8xf32>, vector<8x32xf32>, vector<16x32xf32> -> vector<16x32xf32>
    %98 = arith.addf %74, %97 : vector<16x32xf32>
    %99 = vector.extract_strided_slice %26 {offsets = [0, 24], sizes = [16, 8], strides = [1, 1]} : vector<16x96xf32> to vector<16x8xf32>
    %100 = vector.extract_strided_slice %26 {offsets = [0, 56], sizes = [16, 8], strides = [1, 1]} : vector<16x96xf32> to vector<16x8xf32>
    %101 = vector.extract_strided_slice %26 {offsets = [0, 88], sizes = [16, 8], strides = [1, 1]} : vector<16x96xf32> to vector<16x8xf32>
    %cst_50 = arith.constant dense<0.000000e+00> : vector<16x16xf32>
    %102 = tpu.matmul %99, %100, %cst_50 {dimension_numbers = #tpu.dot_dimension_numbers<[1], [1], [0], [0], [0, 0, 1, 0], [], []>} : vector<16x8xf32>, vector<16x8xf32>, vector<16x16xf32> -> vector<16x16xf32>
    %cst_51 = arith.constant dense<0xFF800000> : vector<16xf32>
    %103 = vector.multi_reduction <maximumf>, %102, %cst_51 [1] : vector<16x16xf32> to vector<16xf32>
    %104 = vector.shape_cast %103 : vector<16xf32> to vector<16x1xf32>
    %105 = vector.broadcast %104 : vector<16x1xf32> to vector<16x16xf32>
    %106 = arith.subf %102, %105 : vector<16x16xf32>
    %107 = math.exp %106 : vector<16x16xf32>
    %108 = arith.mulf %107, %2 : vector<16x16xf32>
    %cst_52 = arith.constant dense<0.000000e+00> : vector<16xf32>
    %109 = vector.multi_reduction <add>, %108, %cst_52 [1] : vector<16x16xf32> to vector<16xf32>
    %110 = vector.shape_cast %109 : vector<16xf32> to vector<16x1xf32>
    %111 = tpu.reciprocal %110 {approx = true} : vector<16x1xf32> -> vector<16x1xf32>
    %112 = arith.mulf %110, %111 : vector<16x1xf32>
    %cst_53 = arith.constant 2.000000e+00 : f32
    %113 = vector.broadcast %cst_53 : f32 to vector<16x1xf32>
    %114 = arith.subf %113, %112 : vector<16x1xf32>
    %115 = arith.mulf %111, %114 : vector<16x1xf32>
    %116 = vector.broadcast %115 : vector<16x1xf32> to vector<16x16xf32>
    %117 = arith.mulf %108, %116 : vector<16x16xf32>
    %cst_54 = arith.constant dense<0.000000e+00> : vector<16x8xf32>
    %118 = tpu.matmul %117, %101, %cst_54 {dimension_numbers = #tpu.dot_dimension_numbers<[1], [0], [0], [1], [0, 0, 1, 1], [], []>} : vector<16x16xf32>, vector<16x8xf32>, vector<16x8xf32> -> vector<16x8xf32>
    %c0_55 = arith.constant 0 : index
    %c56 = arith.constant 56 : index
    %c0_56 = arith.constant 0 : index
    %119 = vector.load %arg1[%c0_55, %c56, %c0_56] : memref<2x304x128xf32, #tpu.memory_space<vmem>>, vector<1x8x32xf32>
    %120 = vector.shape_cast %119 : vector<1x8x32xf32> to vector<8x32xf32>
    %cst_57 = arith.constant dense<0.000000e+00> : vector<16x32xf32>
    %121 = tpu.matmul %118, %120, %cst_57 {dimension_numbers = #tpu.dot_dimension_numbers<[1], [0], [0], [1], [0, 0, 1, 1], [], []>} : vector<16x8xf32>, vector<8x32xf32>, vector<16x32xf32> -> vector<16x32xf32>
    %122 = arith.addf %98, %121 : vector<16x32xf32>
    %123 = arith.addf %0, %122 : vector<16x32xf32>
    %cst_58 = arith.constant dense<0.000000e+00> : vector<16xf32>
    %124 = vector.multi_reduction <add>, %123, %cst_58 [1] : vector<16x32xf32> to vector<16xf32>
    %125 = vector.shape_cast %124 : vector<16xf32> to vector<16x1xf32>
    %cst_59 = arith.constant 3.200000e+01 : f32
    %126 = vector.broadcast %cst_59 : f32 to vector<16x1xf32>
    %127 = arith.divf %125, %126 : vector<16x1xf32>
    %128 = vector.broadcast %127 : vector<16x1xf32> to vector<16x32xf32>
    %129 = arith.subf %123, %128 : vector<16x32xf32>
    %130 = arith.mulf %129, %129 : vector<16x32xf32>
    %cst_60 = arith.constant dense<0.000000e+00> : vector<16xf32>
    %131 = vector.multi_reduction <add>, %130, %cst_60 [1] : vector<16x32xf32> to vector<16xf32>
    %132 = vector.shape_cast %131 : vector<16xf32> to vector<16x1xf32>
    %cst_61 = arith.constant 3.200000e+01 : f32
    %133 = vector.broadcast %cst_61 : f32 to vector<16x1xf32>
    %134 = arith.divf %132, %133 : vector<16x1xf32>
    %135 = vector.broadcast %127 : vector<16x1xf32> to vector<16x32xf32>
    %136 = arith.subf %123, %135 : vector<16x32xf32>
    %cst_62 = arith.constant 9.99999974E-6 : f32
    %137 = vector.broadcast %cst_62 : f32 to vector<16x1xf32>
    %138 = arith.addf %134, %137 : vector<16x1xf32>
    %139 = math.rsqrt %138 : vector<16x1xf32>
    %140 = vector.broadcast %139 : vector<16x1xf32> to vector<16x32xf32>
    %141 = arith.mulf %136, %140 : vector<16x32xf32>
    %142 = arith.mulf %141, %18 : vector<16x32xf32>
    %143 = arith.addf %142, %20 : vector<16x32xf32>
    %cst_63 = arith.constant dense<0.000000e+00> : vector<16x64xf32>
    %144 = tpu.matmul %143, %6, %cst_63 {dimension_numbers = #tpu.dot_dimension_numbers<[1], [0], [0], [1], [0, 0, 1, 1], [], []>} : vector<16x32xf32>, vector<32x64xf32>, vector<16x64xf32> -> vector<16x64xf32>
    %145 = arith.addf %144, %14 : vector<16x64xf32>
    %cst_64 = arith.constant 0.000000e+00 : f32
    %146 = vector.broadcast %cst_64 : f32 to vector<16x64xf32>
    %147 = arith.maximumf %145, %146 : vector<16x64xf32>
    %cst_65 = arith.constant dense<0.000000e+00> : vector<16x32xf32>
    %148 = tpu.matmul %147, %8, %cst_65 {dimension_numbers = #tpu.dot_dimension_numbers<[1], [0], [0], [1], [0, 0, 1, 1], [], []>} : vector<16x64xf32>, vector<64x32xf32>, vector<16x32xf32> -> vector<16x32xf32>
    %149 = arith.addf %143, %148 : vector<16x32xf32>
    %150 = arith.addf %149, %16 : vector<16x32xf32>
    %cst_66 = arith.constant dense<0.000000e+00> : vector<16xf32>
    %151 = vector.multi_reduction <add>, %150, %cst_66 [1] : vector<16x32xf32> to vector<16xf32>
    %152 = vector.shape_cast %151 : vector<16xf32> to vector<16x1xf32>
    %cst_67 = arith.constant 3.200000e+01 : f32
    %153 = vector.broadcast %cst_67 : f32 to vector<16x1xf32>
    %154 = arith.divf %152, %153 : vector<16x1xf32>
    %155 = vector.broadcast %154 : vector<16x1xf32> to vector<16x32xf32>
    %156 = arith.subf %150, %155 : vector<16x32xf32>
    %157 = arith.mulf %156, %156 : vector<16x32xf32>
    %cst_68 = arith.constant dense<0.000000e+00> : vector<16xf32>
    %158 = vector.multi_reduction <add>, %157, %cst_68 [1] : vector<16x32xf32> to vector<16xf32>
    %159 = vector.shape_cast %158 : vector<16xf32> to vector<16x1xf32>
    %cst_69 = arith.constant 3.200000e+01 : f32
    %160 = vector.broadcast %cst_69 : f32 to vector<16x1xf32>
    %161 = arith.divf %159, %160 : vector<16x1xf32>
    %162 = vector.broadcast %154 : vector<16x1xf32> to vector<16x32xf32>
    %163 = arith.subf %150, %162 : vector<16x32xf32>
    %cst_70 = arith.constant 9.99999974E-6 : f32
    %164 = vector.broadcast %cst_70 : f32 to vector<16x1xf32>
    %165 = arith.addf %161, %164 : vector<16x1xf32>
    %166 = math.rsqrt %165 : vector<16x1xf32>
    %167 = vector.broadcast %166 : vector<16x1xf32> to vector<16x32xf32>
    %168 = arith.mulf %163, %167 : vector<16x32xf32>
    %169 = arith.mulf %168, %22 : vector<16x32xf32>
    %170 = arith.addf %169, %24 : vector<16x32xf32>
    %c1 = arith.constant 1 : index
    %c0_71 = arith.constant 0 : index
    %c0_72 = arith.constant 0 : index
    %171 = vector.load %arg1[%c1, %c0_71, %c0_72] : memref<2x304x128xf32, #tpu.memory_space<vmem>>, vector<1x32x96xf32>
    %172 = vector.shape_cast %171 : vector<1x32x96xf32> to vector<32x96xf32>
    %c1_73 = arith.constant 1 : index
    %c64_74 = arith.constant 64 : index
    %c0_75 = arith.constant 0 : index
    %173 = vector.load %arg1[%c1_73, %c64_74, %c0_75] : memref<2x304x128xf32, #tpu.memory_space<vmem>>, vector<1x32x64xf32>
    %174 = vector.shape_cast %173 : vector<1x32x64xf32> to vector<32x64xf32>
    %c1_76 = arith.constant 1 : index
    %c96_77 = arith.constant 96 : index
    %c0_78 = arith.constant 0 : index
    %175 = vector.load %arg1[%c1_76, %c96_77, %c0_78] : memref<2x304x128xf32, #tpu.memory_space<vmem>>, vector<1x64x32xf32>
    %176 = vector.shape_cast %175 : vector<1x64x32xf32> to vector<64x32xf32>
    %c1_79 = arith.constant 1 : index
    %c160_80 = arith.constant 160 : index
    %c0_81 = arith.constant 0 : index
    %177 = vector.load %arg1[%c1_79, %c160_80, %c0_81] : memref<2x304x128xf32, #tpu.memory_space<vmem>>, vector<1x16x96xf32>
    %178 = vector.shape_cast %177 : vector<1x16x96xf32> to vector<16x96xf32>
    %c1_82 = arith.constant 1 : index
    %c176_83 = arith.constant 176 : index
    %c0_84 = arith.constant 0 : index
    %179 = vector.load %arg1[%c1_82, %c176_83, %c0_84] : memref<2x304x128xf32, #tpu.memory_space<vmem>>, vector<1x16x32xf32>
    %180 = vector.shape_cast %179 : vector<1x16x32xf32> to vector<16x32xf32>
    %c1_85 = arith.constant 1 : index
    %c192_86 = arith.constant 192 : index
    %c0_87 = arith.constant 0 : index
    %181 = vector.load %arg1[%c1_85, %c192_86, %c0_87] : memref<2x304x128xf32, #tpu.memory_space<vmem>>, vector<1x16x64xf32>
    %182 = vector.shape_cast %181 : vector<1x16x64xf32> to vector<16x64xf32>
    %c1_88 = arith.constant 1 : index
    %c208_89 = arith.constant 208 : index
    %c0_90 = arith.constant 0 : index
    %183 = vector.load %arg1[%c1_88, %c208_89, %c0_90] : memref<2x304x128xf32, #tpu.memory_space<vmem>>, vector<1x16x32xf32>
    %184 = vector.shape_cast %183 : vector<1x16x32xf32> to vector<16x32xf32>
    %c1_91 = arith.constant 1 : index
    %c224_92 = arith.constant 224 : index
    %c0_93 = arith.constant 0 : index
    %185 = vector.load %arg1[%c1_91, %c224_92, %c0_93] : memref<2x304x128xf32, #tpu.memory_space<vmem>>, vector<1x16x32xf32>
    %186 = vector.shape_cast %185 : vector<1x16x32xf32> to vector<16x32xf32>
    %c1_94 = arith.constant 1 : index
    %c240_95 = arith.constant 240 : index
    %c0_96 = arith.constant 0 : index
    %187 = vector.load %arg1[%c1_94, %c240_95, %c0_96] : memref<2x304x128xf32, #tpu.memory_space<vmem>>, vector<1x16x32xf32>
    %188 = vector.shape_cast %187 : vector<1x16x32xf32> to vector<16x32xf32>
    %c1_97 = arith.constant 1 : index
    %c256_98 = arith.constant 256 : index
    %c0_99 = arith.constant 0 : index
    %189 = vector.load %arg1[%c1_97, %c256_98, %c0_99] : memref<2x304x128xf32, #tpu.memory_space<vmem>>, vector<1x16x32xf32>
    %190 = vector.shape_cast %189 : vector<1x16x32xf32> to vector<16x32xf32>
    %c1_100 = arith.constant 1 : index
    %c272_101 = arith.constant 272 : index
    %c0_102 = arith.constant 0 : index
    %191 = vector.load %arg1[%c1_100, %c272_101, %c0_102] : memref<2x304x128xf32, #tpu.memory_space<vmem>>, vector<1x16x32xf32>
    %192 = vector.shape_cast %191 : vector<1x16x32xf32> to vector<16x32xf32>
    %cst_103 = arith.constant dense<0.000000e+00> : vector<16x96xf32>
    %193 = tpu.matmul %170, %172, %cst_103 {dimension_numbers = #tpu.dot_dimension_numbers<[1], [0], [0], [1], [0, 0, 1, 1], [], []>} : vector<16x32xf32>, vector<32x96xf32>, vector<16x96xf32> -> vector<16x96xf32>
    %194 = arith.addf %193, %178 : vector<16x96xf32>
    %195 = vector.extract_strided_slice %194 {offsets = [0, 0], sizes = [16, 8], strides = [1, 1]} : vector<16x96xf32> to vector<16x8xf32>
    %196 = vector.extract_strided_slice %194 {offsets = [0, 32], sizes = [16, 8], strides = [1, 1]} : vector<16x96xf32> to vector<16x8xf32>
    %197 = vector.extract_strided_slice %194 {offsets = [0, 64], sizes = [16, 8], strides = [1, 1]} : vector<16x96xf32> to vector<16x8xf32>
    %cst_104 = arith.constant dense<0.000000e+00> : vector<16x16xf32>
    %198 = tpu.matmul %195, %196, %cst_104 {dimension_numbers = #tpu.dot_dimension_numbers<[1], [1], [0], [0], [0, 0, 1, 0], [], []>} : vector<16x8xf32>, vector<16x8xf32>, vector<16x16xf32> -> vector<16x16xf32>
    %cst_105 = arith.constant dense<0xFF800000> : vector<16xf32>
    %199 = vector.multi_reduction <maximumf>, %198, %cst_105 [1] : vector<16x16xf32> to vector<16xf32>
    %200 = vector.shape_cast %199 : vector<16xf32> to vector<16x1xf32>
    %201 = vector.broadcast %200 : vector<16x1xf32> to vector<16x16xf32>
    %202 = arith.subf %198, %201 : vector<16x16xf32>
    %203 = math.exp %202 : vector<16x16xf32>
    %204 = arith.mulf %203, %2 : vector<16x16xf32>
    %cst_106 = arith.constant dense<0.000000e+00> : vector<16xf32>
    %205 = vector.multi_reduction <add>, %204, %cst_106 [1] : vector<16x16xf32> to vector<16xf32>
    %206 = vector.shape_cast %205 : vector<16xf32> to vector<16x1xf32>
    %207 = tpu.reciprocal %206 {approx = true} : vector<16x1xf32> -> vector<16x1xf32>
    %208 = arith.mulf %206, %207 : vector<16x1xf32>
    %cst_107 = arith.constant 2.000000e+00 : f32
    %209 = vector.broadcast %cst_107 : f32 to vector<16x1xf32>
    %210 = arith.subf %209, %208 : vector<16x1xf32>
    %211 = arith.mulf %207, %210 : vector<16x1xf32>
    %212 = vector.broadcast %211 : vector<16x1xf32> to vector<16x16xf32>
    %213 = arith.mulf %204, %212 : vector<16x16xf32>
    %cst_108 = arith.constant dense<0.000000e+00> : vector<16x8xf32>
    %214 = tpu.matmul %213, %197, %cst_108 {dimension_numbers = #tpu.dot_dimension_numbers<[1], [0], [0], [1], [0, 0, 1, 1], [], []>} : vector<16x16xf32>, vector<16x8xf32>, vector<16x8xf32> -> vector<16x8xf32>
    %c1_109 = arith.constant 1 : index
    %c32_110 = arith.constant 32 : index
    %c0_111 = arith.constant 0 : index
    %215 = vector.load %arg1[%c1_109, %c32_110, %c0_111] : memref<2x304x128xf32, #tpu.memory_space<vmem>>, vector<1x8x32xf32>
    %216 = vector.shape_cast %215 : vector<1x8x32xf32> to vector<8x32xf32>
    %cst_112 = arith.constant dense<0.000000e+00> : vector<16x32xf32>
    %217 = tpu.matmul %214, %216, %cst_112 {dimension_numbers = #tpu.dot_dimension_numbers<[1], [0], [0], [1], [0, 0, 1, 1], [], []>} : vector<16x8xf32>, vector<8x32xf32>, vector<16x32xf32> -> vector<16x32xf32>
    %218 = arith.addf %180, %217 : vector<16x32xf32>
    %219 = vector.extract_strided_slice %194 {offsets = [0, 8], sizes = [16, 8], strides = [1, 1]} : vector<16x96xf32> to vector<16x8xf32>
    %220 = vector.extract_strided_slice %194 {offsets = [0, 40], sizes = [16, 8], strides = [1, 1]} : vector<16x96xf32> to vector<16x8xf32>
    %221 = vector.extract_strided_slice %194 {offsets = [0, 72], sizes = [16, 8], strides = [1, 1]} : vector<16x96xf32> to vector<16x8xf32>
    %cst_113 = arith.constant dense<0.000000e+00> : vector<16x16xf32>
    %222 = tpu.matmul %219, %220, %cst_113 {dimension_numbers = #tpu.dot_dimension_numbers<[1], [1], [0], [0], [0, 0, 1, 0], [], []>} : vector<16x8xf32>, vector<16x8xf32>, vector<16x16xf32> -> vector<16x16xf32>
    %cst_114 = arith.constant dense<0xFF800000> : vector<16xf32>
    %223 = vector.multi_reduction <maximumf>, %222, %cst_114 [1] : vector<16x16xf32> to vector<16xf32>
    %224 = vector.shape_cast %223 : vector<16xf32> to vector<16x1xf32>
    %225 = vector.broadcast %224 : vector<16x1xf32> to vector<16x16xf32>
    %226 = arith.subf %222, %225 : vector<16x16xf32>
    %227 = math.exp %226 : vector<16x16xf32>
    %228 = arith.mulf %227, %2 : vector<16x16xf32>
    %cst_115 = arith.constant dense<0.000000e+00> : vector<16xf32>
    %229 = vector.multi_reduction <add>, %228, %cst_115 [1] : vector<16x16xf32> to vector<16xf32>
    %230 = vector.shape_cast %229 : vector<16xf32> to vector<16x1xf32>
    %231 = tpu.reciprocal %230 {approx = true} : vector<16x1xf32> -> vector<16x1xf32>
    %232 = arith.mulf %230, %231 : vector<16x1xf32>
    %cst_116 = arith.constant 2.000000e+00 : f32
    %233 = vector.broadcast %cst_116 : f32 to vector<16x1xf32>
    %234 = arith.subf %233, %232 : vector<16x1xf32>
    %235 = arith.mulf %231, %234 : vector<16x1xf32>
    %236 = vector.broadcast %235 : vector<16x1xf32> to vector<16x16xf32>
    %237 = arith.mulf %228, %236 : vector<16x16xf32>
    %cst_117 = arith.constant dense<0.000000e+00> : vector<16x8xf32>
    %238 = tpu.matmul %237, %221, %cst_117 {dimension_numbers = #tpu.dot_dimension_numbers<[1], [0], [0], [1], [0, 0, 1, 1], [], []>} : vector<16x16xf32>, vector<16x8xf32>, vector<16x8xf32> -> vector<16x8xf32>
    %c1_118 = arith.constant 1 : index
    %c40_119 = arith.constant 40 : index
    %c0_120 = arith.constant 0 : index
    %239 = vector.load %arg1[%c1_118, %c40_119, %c0_120] : memref<2x304x128xf32, #tpu.memory_space<vmem>>, vector<1x8x32xf32>
    %240 = vector.shape_cast %239 : vector<1x8x32xf32> to vector<8x32xf32>
    %cst_121 = arith.constant dense<0.000000e+00> : vector<16x32xf32>
    %241 = tpu.matmul %238, %240, %cst_121 {dimension_numbers = #tpu.dot_dimension_numbers<[1], [0], [0], [1], [0, 0, 1, 1], [], []>} : vector<16x8xf32>, vector<8x32xf32>, vector<16x32xf32> -> vector<16x32xf32>
    %242 = arith.addf %218, %241 : vector<16x32xf32>
    %243 = vector.extract_strided_slice %194 {offsets = [0, 16], sizes = [16, 8], strides = [1, 1]} : vector<16x96xf32> to vector<16x8xf32>
    %244 = vector.extract_strided_slice %194 {offsets = [0, 48], sizes = [16, 8], strides = [1, 1]} : vector<16x96xf32> to vector<16x8xf32>
    %245 = vector.extract_strided_slice %194 {offsets = [0, 80], sizes = [16, 8], strides = [1, 1]} : vector<16x96xf32> to vector<16x8xf32>
    %cst_122 = arith.constant dense<0.000000e+00> : vector<16x16xf32>
    %246 = tpu.matmul %243, %244, %cst_122 {dimension_numbers = #tpu.dot_dimension_numbers<[1], [1], [0], [0], [0, 0, 1, 0], [], []>} : vector<16x8xf32>, vector<16x8xf32>, vector<16x16xf32> -> vector<16x16xf32>
    %cst_123 = arith.constant dense<0xFF800000> : vector<16xf32>
    %247 = vector.multi_reduction <maximumf>, %246, %cst_123 [1] : vector<16x16xf32> to vector<16xf32>
    %248 = vector.shape_cast %247 : vector<16xf32> to vector<16x1xf32>
    %249 = vector.broadcast %248 : vector<16x1xf32> to vector<16x16xf32>
    %250 = arith.subf %246, %249 : vector<16x16xf32>
    %251 = math.exp %250 : vector<16x16xf32>
    %252 = arith.mulf %251, %2 : vector<16x16xf32>
    %cst_124 = arith.constant dense<0.000000e+00> : vector<16xf32>
    %253 = vector.multi_reduction <add>, %252, %cst_124 [1] : vector<16x16xf32> to vector<16xf32>
    %254 = vector.shape_cast %253 : vector<16xf32> to vector<16x1xf32>
    %255 = tpu.reciprocal %254 {approx = true} : vector<16x1xf32> -> vector<16x1xf32>
    %256 = arith.mulf %254, %255 : vector<16x1xf32>
    %cst_125 = arith.constant 2.000000e+00 : f32
    %257 = vector.broadcast %cst_125 : f32 to vector<16x1xf32>
    %258 = arith.subf %257, %256 : vector<16x1xf32>
    %259 = arith.mulf %255, %258 : vector<16x1xf32>
    %260 = vector.broadcast %259 : vector<16x1xf32> to vector<16x16xf32>
    %261 = arith.mulf %252, %260 : vector<16x16xf32>
    %cst_126 = arith.constant dense<0.000000e+00> : vector<16x8xf32>
    %262 = tpu.matmul %261, %245, %cst_126 {dimension_numbers = #tpu.dot_dimension_numbers<[1], [0], [0], [1], [0, 0, 1, 1], [], []>} : vector<16x16xf32>, vector<16x8xf32>, vector<16x8xf32> -> vector<16x8xf32>
    %c1_127 = arith.constant 1 : index
    %c48_128 = arith.constant 48 : index
    %c0_129 = arith.constant 0 : index
    %263 = vector.load %arg1[%c1_127, %c48_128, %c0_129] : memref<2x304x128xf32, #tpu.memory_space<vmem>>, vector<1x8x32xf32>
    %264 = vector.shape_cast %263 : vector<1x8x32xf32> to vector<8x32xf32>
    %cst_130 = arith.constant dense<0.000000e+00> : vector<16x32xf32>
    %265 = tpu.matmul %262, %264, %cst_130 {dimension_numbers = #tpu.dot_dimension_numbers<[1], [0], [0], [1], [0, 0, 1, 1], [], []>} : vector<16x8xf32>, vector<8x32xf32>, vector<16x32xf32> -> vector<16x32xf32>
    %266 = arith.addf %242, %265 : vector<16x32xf32>
    %267 = vector.extract_strided_slice %194 {offsets = [0, 24], sizes = [16, 8], strides = [1, 1]} : vector<16x96xf32> to vector<16x8xf32>
    %268 = vector.extract_strided_slice %194 {offsets = [0, 56], sizes = [16, 8], strides = [1, 1]} : vector<16x96xf32> to vector<16x8xf32>
    %269 = vector.extract_strided_slice %194 {offsets = [0, 88], sizes = [16, 8], strides = [1, 1]} : vector<16x96xf32> to vector<16x8xf32>
    %cst_131 = arith.constant dense<0.000000e+00> : vector<16x16xf32>
    %270 = tpu.matmul %267, %268, %cst_131 {dimension_numbers = #tpu.dot_dimension_numbers<[1], [1], [0], [0], [0, 0, 1, 0], [], []>} : vector<16x8xf32>, vector<16x8xf32>, vector<16x16xf32> -> vector<16x16xf32>
    %cst_132 = arith.constant dense<0xFF800000> : vector<16xf32>
    %271 = vector.multi_reduction <maximumf>, %270, %cst_132 [1] : vector<16x16xf32> to vector<16xf32>
    %272 = vector.shape_cast %271 : vector<16xf32> to vector<16x1xf32>
    %273 = vector.broadcast %272 : vector<16x1xf32> to vector<16x16xf32>
    %274 = arith.subf %270, %273 : vector<16x16xf32>
    %275 = math.exp %274 : vector<16x16xf32>
    %276 = arith.mulf %275, %2 : vector<16x16xf32>
    %cst_133 = arith.constant dense<0.000000e+00> : vector<16xf32>
    %277 = vector.multi_reduction <add>, %276, %cst_133 [1] : vector<16x16xf32> to vector<16xf32>
    %278 = vector.shape_cast %277 : vector<16xf32> to vector<16x1xf32>
    %279 = tpu.reciprocal %278 {approx = true} : vector<16x1xf32> -> vector<16x1xf32>
    %280 = arith.mulf %278, %279 : vector<16x1xf32>
    %cst_134 = arith.constant 2.000000e+00 : f32
    %281 = vector.broadcast %cst_134 : f32 to vector<16x1xf32>
    %282 = arith.subf %281, %280 : vector<16x1xf32>
    %283 = arith.mulf %279, %282 : vector<16x1xf32>
    %284 = vector.broadcast %283 : vector<16x1xf32> to vector<16x16xf32>
    %285 = arith.mulf %276, %284 : vector<16x16xf32>
    %cst_135 = arith.constant dense<0.000000e+00> : vector<16x8xf32>
    %286 = tpu.matmul %285, %269, %cst_135 {dimension_numbers = #tpu.dot_dimension_numbers<[1], [0], [0], [1], [0, 0, 1, 1], [], []>} : vector<16x16xf32>, vector<16x8xf32>, vector<16x8xf32> -> vector<16x8xf32>
    %c1_136 = arith.constant 1 : index
    %c56_137 = arith.constant 56 : index
    %c0_138 = arith.constant 0 : index
    %287 = vector.load %arg1[%c1_136, %c56_137, %c0_138] : memref<2x304x128xf32, #tpu.memory_space<vmem>>, vector<1x8x32xf32>
    %288 = vector.shape_cast %287 : vector<1x8x32xf32> to vector<8x32xf32>
    %cst_139 = arith.constant dense<0.000000e+00> : vector<16x32xf32>
    %289 = tpu.matmul %286, %288, %cst_139 {dimension_numbers = #tpu.dot_dimension_numbers<[1], [0], [0], [1], [0, 0, 1, 1], [], []>} : vector<16x8xf32>, vector<8x32xf32>, vector<16x32xf32> -> vector<16x32xf32>
    %290 = arith.addf %266, %289 : vector<16x32xf32>
    %291 = arith.addf %170, %290 : vector<16x32xf32>
    %cst_140 = arith.constant dense<0.000000e+00> : vector<16xf32>
    %292 = vector.multi_reduction <add>, %291, %cst_140 [1] : vector<16x32xf32> to vector<16xf32>
    %293 = vector.shape_cast %292 : vector<16xf32> to vector<16x1xf32>
    %cst_141 = arith.constant 3.200000e+01 : f32
    %294 = vector.broadcast %cst_141 : f32 to vector<16x1xf32>
    %295 = arith.divf %293, %294 : vector<16x1xf32>
    %296 = vector.broadcast %295 : vector<16x1xf32> to vector<16x32xf32>
    %297 = arith.subf %291, %296 : vector<16x32xf32>
    %298 = arith.mulf %297, %297 : vector<16x32xf32>
    %cst_142 = arith.constant dense<0.000000e+00> : vector<16xf32>
    %299 = vector.multi_reduction <add>, %298, %cst_142 [1] : vector<16x32xf32> to vector<16xf32>
    %300 = vector.shape_cast %299 : vector<16xf32> to vector<16x1xf32>
    %cst_143 = arith.constant 3.200000e+01 : f32
    %301 = vector.broadcast %cst_143 : f32 to vector<16x1xf32>
    %302 = arith.divf %300, %301 : vector<16x1xf32>
    %303 = vector.broadcast %295 : vector<16x1xf32> to vector<16x32xf32>
    %304 = arith.subf %291, %303 : vector<16x32xf32>
    %cst_144 = arith.constant 9.99999974E-6 : f32
    %305 = vector.broadcast %cst_144 : f32 to vector<16x1xf32>
    %306 = arith.addf %302, %305 : vector<16x1xf32>
    %307 = math.rsqrt %306 : vector<16x1xf32>
    %308 = vector.broadcast %307 : vector<16x1xf32> to vector<16x32xf32>
    %309 = arith.mulf %304, %308 : vector<16x32xf32>
    %310 = arith.mulf %309, %186 : vector<16x32xf32>
    %311 = arith.addf %310, %188 : vector<16x32xf32>
    %cst_145 = arith.constant dense<0.000000e+00> : vector<16x64xf32>
    %312 = tpu.matmul %311, %174, %cst_145 {dimension_numbers = #tpu.dot_dimension_numbers<[1], [0], [0], [1], [0, 0, 1, 1], [], []>} : vector<16x32xf32>, vector<32x64xf32>, vector<16x64xf32> -> vector<16x64xf32>
    %313 = arith.addf %312, %182 : vector<16x64xf32>
    %cst_146 = arith.constant 0.000000e+00 : f32
    %314 = vector.broadcast %cst_146 : f32 to vector<16x64xf32>
    %315 = arith.maximumf %313, %314 : vector<16x64xf32>
    %cst_147 = arith.constant dense<0.000000e+00> : vector<16x32xf32>
    %316 = tpu.matmul %315, %176, %cst_147 {dimension_numbers = #tpu.dot_dimension_numbers<[1], [0], [0], [1], [0, 0, 1, 1], [], []>} : vector<16x64xf32>, vector<64x32xf32>, vector<16x32xf32> -> vector<16x32xf32>
    %317 = arith.addf %311, %316 : vector<16x32xf32>
    %318 = arith.addf %317, %184 : vector<16x32xf32>
    %cst_148 = arith.constant dense<0.000000e+00> : vector<16xf32>
    %319 = vector.multi_reduction <add>, %318, %cst_148 [1] : vector<16x32xf32> to vector<16xf32>
    %320 = vector.shape_cast %319 : vector<16xf32> to vector<16x1xf32>
    %cst_149 = arith.constant 3.200000e+01 : f32
    %321 = vector.broadcast %cst_149 : f32 to vector<16x1xf32>
    %322 = arith.divf %320, %321 : vector<16x1xf32>
    %323 = vector.broadcast %322 : vector<16x1xf32> to vector<16x32xf32>
    %324 = arith.subf %318, %323 : vector<16x32xf32>
    %325 = arith.mulf %324, %324 : vector<16x32xf32>
    %cst_150 = arith.constant dense<0.000000e+00> : vector<16xf32>
    %326 = vector.multi_reduction <add>, %325, %cst_150 [1] : vector<16x32xf32> to vector<16xf32>
    %327 = vector.shape_cast %326 : vector<16xf32> to vector<16x1xf32>
    %cst_151 = arith.constant 3.200000e+01 : f32
    %328 = vector.broadcast %cst_151 : f32 to vector<16x1xf32>
    %329 = arith.divf %327, %328 : vector<16x1xf32>
    %330 = vector.broadcast %322 : vector<16x1xf32> to vector<16x32xf32>
    %331 = arith.subf %318, %330 : vector<16x32xf32>
    %cst_152 = arith.constant 9.99999974E-6 : f32
    %332 = vector.broadcast %cst_152 : f32 to vector<16x1xf32>
    %333 = arith.addf %329, %332 : vector<16x1xf32>
    %334 = math.rsqrt %333 : vector<16x1xf32>
    %335 = vector.broadcast %334 : vector<16x1xf32> to vector<16x32xf32>
    %336 = arith.mulf %331, %335 : vector<16x32xf32>
    %337 = arith.mulf %336, %190 : vector<16x32xf32>
    %338 = arith.addf %337, %192 : vector<16x32xf32>
    %c0_153 = arith.constant 0 : index
    %c0_154 = arith.constant 0 : index
    %339 = vector.load %arg2[%c0_153, %c0_154] : memref<16x32xf32, #tpu.memory_space<vmem>>, vector<16x32xf32>
    tpu.vector_store %arg2[%c0_153, %c0_154], %338 {strides = array<i32>} : memref<16x32xf32, #tpu.memory_space<vmem>>, vector<16x32xf32>,
    return
  }
}

</mosaic_0001>

<bundles_post_ra>
// kernel: custom_transformer_encoder.1
= control target key start
LH: loop header
LB: loop body
LE: loop exit
PB: predicated region body
PF: predicated region fallthrough
CT: control target
= control target key end

     0   :  { %7 = vsyncpa [#allocation3], 0  ;;  %s3620_s9 = smov [#allocation2]   ;;  %s3967_s0 = inlined_call_operand.vmem [shape: f32[16,32], index: 0, kind: input, shape index: {}]   ;;  %s3968_s1 = inlined_call_operand.hbm [shape: f32[2,304,128], index: 1, kind: input, shape index: {}]   ;;  %s3969_s2 = inlined_call_operand.vmem [shape: f32[16,32], index: 2, kind: output, shape index: {}]  }
   0x1   :  { %s15_s10 = sshll.u32 %s3620_s9, 4  ;;  %s16_s10 = int_to_ptr.vmem [resolvable:$true] %s15_s10 }
   0x2   :  { %s3606_s11 = scalar_lea.vmem %s16_s10, 9728  ;;  %p3611_p1 = scmp.lt.s32.totalorder %s16_s10, %s16_s10 }
   0x3   :  { %p3607_p0 = scmp.ne.s32.totalorder %s16_s10, %s3606_s11  ;;  %p3612_p2 = scmp.lt.s32.totalorder %s3606_s11, %s3606_s11 }
   0x5   :  { %p3613_p3 = por %p3612_p2, %p3611_p1 }
   0x7   :  { %p3614_p4 = pnand %p3613_p3, %p3607_p0 }
   0x9   :  { %3617 = shalt.err (!%p3614_p4)
}
   0xa   :  { %s3621_s12 = smov 128   ;;  %s3622_s13 = smov 8  }
   0xb   :  { %21 = dma.hbm_to_vmem [thread:$0]  %s3968_s1, 9728, %s16_s10, [#allocation3], %s3621_s12, %s3621_s12, %s3622_s13  }
   0xc   :  { %3618 = dma.done.wait [#allocation3], 9728  }
   0xd   :  { %3619 = vsyncadd [#allocation3], 4294957568  ;;  %vm61_vm0 = vcmask 261120   ;;  %v32_v0 = vld [vmem:[#allocation2 + $0x18] sm:$0xff]  ;;  %v31_v1 = vld [vmem:[#allocation2 + $0x10] sm:$0xff]  ;;  %vm149_vm1 = vcmask 64512  }
   0xe   :  { %3268 = vmatprep.subr.mxu0 %v32_v0  ;;  %v3655_v2 = vld [vmem:[%s3967_s0] sm:$0xff]  ;;  %v30_v3 = vld [vmem:[#allocation2 + $0x8] sm:$0xff]  ;;  %s3623_s19 = smov 96   ;;  %vm233_vm2 = vcmask 130048   ;;  %s3625_s20 = smov 120   ;;  %vm1427_vm3 = vcmask 523264  }
   0xf   :  { %3269 = vmatpush3.msra.mxu0 %v32_v0  ;;  %3276 = vmatprep.mubr.msk.f32.mxu0 %vm61_vm0, %v3655_v2  ;;  %v29_v4 = vld [vmem:[#allocation2] sm:$0xff]  ;;  %v3662_v5 = vld [vmem:[%s3967_s0 + $0x8] sm:$0xff]  ;;  %s3624_s0 = smov 64   ;;  %s3626_s21 = smov 88  }
  0x10   :  { %3270 = vmatprep.subr.mxu0 %v31_v1  ;;  %v46_v6 = vld [vmem:[#allocation2 + $0xa8] sm:$0xff]  ;;  %v45_v8 = vld [vmem:[#allocation2 + $0xa0] sm:$0xff]  ;;  %s3627_s22 = smov 80   ;;  %s3628_s23 = smov 112  }
  0x11   :  { %3271 = vmatpush3.msra.mxu0 %v31_v1  ;;  %v3684_v24 = vld [vmem:[#allocation2 + $0x120] sm:$0xff]  ;;  %v3687_v27 = vld [vmem:[#allocation2 + $0x128] sm:$0xff]  ;;  %s3629_s24 = smov 56   ;;  %s3630_s25 = smov 72  }
  0x12   :  { %3272 = vmatprep.subr.mxu0 %v30_v3  ;;  %v351_v36 = vld [vmem:[#allocation2 + $0x20] sm:$0xff]  ;;  %s3631_s26 = smov 104   ;;  %s3632_s27 = smov 48  }
  0x13   :  { %3273 = vmatpush3.msra.mxu0 %v30_v3  ;;  %s3633_s28 = smov 40  }
  0x14   :  { %3274 = vmatprep.subr.mxu0 %v29_v4 }
  0x15   :  { %3275 = vmatpush3.msra.mxu0 %v29_v4 }
  0x16   :  { %3277 = vmatmul.mubr.msk.f32.vlgmr.msra.gmra.mxu0 %vm61_vm0, %v3662_v5 }
  0xd6   :  { %v3278_v7 = vpop.f32.mrf.mxu0 }
  0xd7   :  { %v3666_v9 = vadd.f32 %v3278_v7, %v46_v6 }
  0xd8   :  { %v134_v10 = vpop.f32.mrf.mxu0 }
  0xd9   :  { %v3668_v11 = vadd.f32 %v134_v10, %v45_v8  ;;  %147 = vrot.lane.b32.xlu0 %v3666_v9, %s3623_s19 }
  0xdb   :  { %3283 = vmatprep.mubr.msk.f32.mxu1 %vm149_vm1, %v3668_v11 }
  0xdd   :  { %145 = vrot.lane.b32.xlu0 %v3668_v11, %s3623_s19 }
 0x14b   :  { %v148_v12 = vpop.permute.xlu0 %147 }
 0x14c   :  { %3279 = vmatprep.subr.msk.mxu1 %vm149_vm1, %v148_v12 }
 0x14d   :  { %3280 = vmatpush3.xpose.msk.msra.mxu1 %vm149_vm1, %v148_v12 }
 0x14f   :  { %v146_v13 = vpop.permute.xlu0 %145 }
 0x150   :  { %3281 = vmatprep.subr.msk.mxu1 %vm149_vm1, %v146_v13 }
 0x151   :  { %3282 = vmatpush3.xpose.msk.msra.mxu1 %vm149_vm1, %v146_v13 }
 0x154   :  { %3284 = vmatmul.mubr.msk.f32.vlgmr.msra.gmra.mxu1 %vm149_vm1, %v3666_v9 }
 0x214   :  { %v3285_v14 = vpop.f32.mrf.mxu1 }
 0x215   :  { %v237_v17 = vsel %vm233_vm2, %v3285_v14, -inf }
 0x216   :  { %v224_v15 = vpop.f32.mrf.mxu1 }
 0x217   :  { %v234_v16 = vsel %vm233_vm2, %v224_v15, -inf }
 0x218   :  { %235 = vmax.xlane.f32.xlu1 %v234_v16 }
 0x21c   :  { %238 = vmax.xlane.f32.xlu1 %v237_v17 }
 0x2a1   :  { %v236_v18 = vpop.xlane.xlu1 %235 }
 0x2a2   :  { %v240_v19 = vsub.f32 %v224_v15, %v236_v18 }
 0x2a4   :  { %v242_v20 = vmul.f32 1.442695, %v240_v19 }
 0x2a5   :  { %v239_v21 = vpop.xlane.xlu1 %238 }
 0x2a6   :  { %3516 = vpow2.f32 %v242_v20  ;;  %v241_v22 = vsub.f32 %v3285_v14, %v239_v21 }
 0x2a8   :  { %v244_v23 = vmul.f32 1.442695, %v241_v22 }
 0x2aa   :  { %3518 = vpow2.f32 %v244_v23 }
 0x2b3   :  { %v3517_v25 = vpop.eup %3516 }
 0x2b4   :  { %v246_v26 = vmul.f32 %v3517_v25, %v3684_v24 }
 0x2b6   :  { %v248_v28 = vsel %vm233_vm2, %v246_v26, 0.0 }
 0x2b7   :  { %v3519_v29 = vpop.eup %3518  ;;  %249 = vadd.xlane.f32.xlu0 %v248_v28 }
 0x2b8   :  { %v247_v30 = vmul.f32 %v3519_v29, %v3687_v27 }
 0x2ba   :  { %v251_v31 = vsel %vm233_vm2, %v247_v30, 0.0 }
 0x2bb   :  { %252 = vadd.xlane.f32.xlu1 %v251_v31 }
 0x2cc   :  { %266 = vrot.lane.b32.xlu1 %v3666_v9, %s3624_s0 }
 0x2cd   :  { %435 = vrot.lane.b32.xlu0 %v3668_v11, %s3625_s20 }
 0x2d0   :  { %264 = vrot.lane.b32.xlu1 %v3668_v11, %s3624_s0 }
 0x2d4   :  { %441 = vrot.lane.b32.xlu1 %v3666_v9, %s3626_s21 }
 0x2d8   :  { %439 = vrot.lane.b32.xlu1 %v3668_v11, %s3626_s21 }
 0x2dc   :  { %437 = vrot.lane.b32.xlu1 %v3666_v9, %s3625_s20 }
 0x2e0   :  { %733 = vrot.lane.b32.xlu1 %v3666_v9, %s3627_s22 }
 0x2e4   :  { %731 = vrot.lane.b32.xlu1 %v3668_v11, %s3627_s22 }
 0x2e8   :  { %727 = vrot.lane.b32.xlu1 %v3668_v11, %s3628_s23 }
 0x2ec   :  { %729 = vrot.lane.b32.xlu1 %v3666_v9, %s3628_s23 }
 0x340   :  { %v250_v32 = vpop.xlane.xlu0 %249 }
 0x341   :  { %3520 = vrcp.f32 %v250_v32 }
 0x344   :  { %v253_v33 = vpop.xlane.xlu1 %252  ;;  %v436_v53 = vpop.permute.xlu0 %435 }
 0x345   :  { %3522 = vrcp.f32 %v253_v33 }
 0x348   :  { %v267_v34 = vpop.permute.xlu1 %266 }
 0x349   :  { %3286 = vmatprep.subr.mxu0 %v267_v34 }
 0x34a   :  { %3287 = vmatpush3.msra.mxu0 %v267_v34 }
 0x34c   :  { %v265_v35 = vpop.permute.xlu1 %264 }
 0x34d   :  { %3288 = vmatprep.subr.mxu0 %v265_v35 }
 0x34e   :  { %v3521_v37 = vpop.eup %3520  ;;  %3289 = vmatpush3.msra.mxu0 %v265_v35 }
 0x34f   :  { %v256_v38 = vmul.f32 %v3521_v37, %v250_v32  ;;  %3293 = vmatprep.subr.mxu0 %v351_v36 }
 0x350   :  { %v442_v47 = vpop.permute.xlu1 %441 }
 0x351   :  { %v258_v39 = vsub.f32 2.0, %v256_v38 }
 0x352   :  { %v3523_v40 = vpop.eup %3522 }
 0x353   :  { %v260_v41 = vmul.f32 %v3521_v37, %v258_v39  ;;  %v257_v42 = vmul.f32 %v3523_v40, %v253_v33 }
 0x354   :  { %v440_v48 = vpop.permute.xlu1 %439 }
 0x355   :  { %v262_v43 = vmul.f32 %v260_v41, %v246_v26  ;;  %v259_v44 = vsub.f32 2.0, %v257_v42  ;;  %v643_v26 = vld [vmem:[#allocation2 + $0x28] sm:$0xff] }
 0x357   :  { %v261_v45 = vmul.f32 %v3523_v40, %v259_v44  ;;  %3290 = vmatprep.mubr.msk.f32.mxu0 %vm233_vm2, %v262_v43 }
 0x358   :  { %v438_v49 = vpop.permute.xlu1 %437 }
 0x359   :  { %v263_v46 = vmul.f32 %v261_v45, %v247_v30 }
 0x35b   :  { %3291 = vmatmul.mubr.msk.f32.vlgmr.msra.gmra.mxu0 %vm233_vm2, %v263_v46 }
 0x35c   :  { %3294 = vmatpush3.msra.mxu0 %v351_v36  ;;  %v734_v50 = vpop.permute.xlu1 %733 }
 0x35d   :  { %3298 = vmatprep.subr.msk.mxu0 %vm149_vm1, %v442_v47 }
 0x360   :  { %v732_v54 = vpop.permute.xlu1 %731 }
 0x364   :  { %v728_v55 = vpop.permute.xlu1 %727 }
 0x368   :  { %v730_v56 = vpop.permute.xlu1 %729 }
 0x41b   :  { %v3292_v51 = vpop.f32.mrf.mxu0 }
 0x41d   :  { %v342_v52 = vpop.f32.mrf.mxu0 }
 0x41e   :  { %3295 = vmatprep.mubr.msk.f32.mxu0 %vm149_vm1, %v342_v52 }
 0x41f   :  { %3296 = vmatmul.mubr.msk.f32.vlgmr.msra.gmra.mxu0 %vm149_vm1, %v3292_v51 }
 0x420   :  { %3299 = vmatpush3.xpose.msk.msra.mxu0 %vm149_vm1, %v442_v47  ;;  %3302 = vmatprep.mubr.msk.f32.mxu0 %vm149_vm1, %v436_v53 }
 0x421   :  { %3300 = vmatprep.subr.msk.mxu0 %vm149_vm1, %v440_v48 }
 0x424   :  { %3301 = vmatpush3.xpose.msk.msra.mxu0 %vm149_vm1, %v440_v48 }
 0x425   :  { %3317 = vmatprep.subr.msk.mxu0 %vm149_vm1, %v734_v50 }
 0x427   :  { %3303 = vmatmul.mubr.msk.f32.vlgmr.msra.gmra.mxu0 %vm149_vm1, %v438_v49 }
 0x428   :  { %3318 = vmatpush3.xpose.msk.msra.mxu0 %vm149_vm1, %v734_v50  ;;  %3321 = vmatprep.mubr.msk.f32.mxu0 %vm149_vm1, %v728_v55 }
 0x429   :  { %3319 = vmatprep.subr.msk.mxu0 %vm149_vm1, %v732_v54 }
 0x42c   :  { %3320 = vmatpush3.xpose.msk.msra.mxu0 %vm149_vm1, %v732_v54 }
 0x42f   :  { %3322 = vmatmul.mubr.msk.f32.vlgmr.msra.gmra.mxu0 %vm149_vm1, %v730_v56 }
 0x4df   :  { %v3728_v57 = vpop.f32.mrf.mxu0 }
 0x4e1   :  { %v3730_v58 = vpop.f32.mrf.mxu0 }
 0x4e7   :  { %v3304_v59 = vpop.f32.mrf.mxu0 }
 0x4e8   :  { %v529_v60 = vsel %vm233_vm2, %v3304_v59, -inf }
 0x4e9   :  { %530 = vmax.xlane.f32.xlu1 %v529_v60  ;;  %v517_v61 = vpop.f32.mrf.mxu0 }
 0x4ea   :  { %v526_v62 = vsel %vm233_vm2, %v517_v61, -inf }
 0x4eb   :  { %527 = vmax.xlane.f32.xlu0 %v526_v62 }
 0x4ef   :  { %v3742_v63 = vpop.f32.mrf.mxu0 }
 0x4f0   :  { %v821_v0 = vsel %vm233_vm2, %v3742_v63, -inf }
 0x4f1   :  { %v809_v20 = vpop.f32.mrf.mxu0 }
 0x4f2   :  { %v818_v21 = vsel %vm233_vm2, %v809_v20, -inf }
 0x4fa   :  { %558 = vrot.lane.b32.xlu1 %v3666_v9, %s3629_s24 }
 0x4fe   :  { %1025 = vrot.lane.b32.xlu1 %v3666_v9, %s3630_s25 }
 0x502   :  { %1023 = vrot.lane.b32.xlu1 %v3668_v11, %s3630_s25 }
 0x506   :  { %1021 = vrot.lane.b32.xlu1 %v3666_v9, %s3631_s26 }
 0x52a   :  { %822 = vmax.xlane.f32.xlu1 %v821_v0 }
 0x53b   :  { %850 = vrot.lane.b32.xlu1 %v3666_v9, %s3632_s27 }
 0x572   :  { %v531_v1 = vpop.xlane.xlu1 %530 }
 0x573   :  { %v533_v3 = vsub.f32 %v3304_v59, %v531_v1 }
 0x574   :  { %v528_v4 = vpop.xlane.xlu0 %527 }
 0x575   :  { %v536_v6 = vmul.f32 1.442695, %v533_v3  ;;  %v532_v7 = vsub.f32 %v517_v61, %v528_v4 }
 0x576   :  { %v559_v8 = vpop.permute.xlu1 %558 }
 0x577   :  { %v534_v10 = vmul.f32 1.442695, %v532_v7  ;;  %3305 = vmatprep.subr.mxu1 %v559_v8  ;;  %3524 = vpow2.f32 %v536_v6 }
 0x578   :  { %3306 = vmatpush3.msra.mxu1 %v559_v8 }
 0x579   :  { %3526 = vpow2.f32 %v534_v10 }
 0x57a   :  { %v1026_v12 = vpop.permute.xlu1 %1025 }
 0x57b   :  { %3336 = vmatprep.subr.msk.mxu0 %vm149_vm1, %v1026_v12 }
 0x57c   :  { %3337 = vmatpush3.xpose.msk.msra.mxu0 %vm149_vm1, %v1026_v12 }
 0x57e   :  { %v1024_v13 = vpop.permute.xlu1 %1023 }
 0x57f   :  { %3338 = vmatprep.subr.msk.mxu0 %vm149_vm1, %v1024_v13 }
 0x580   :  { %3339 = vmatpush3.xpose.msk.msra.mxu0 %vm149_vm1, %v1024_v13 }
 0x582   :  { %v1022_v29 = vpop.permute.xlu1 %1021 }
 0x584   :  { %v3525_v14 = vpop.eup %3524 }
 0x585   :  { %v539_v18 = vmul.f32 %v3525_v14, %v3687_v27  ;;  %v935_v14 = vld [vmem:[#allocation2 + $0x30] sm:$0xff] }
 0x586   :  { %v3527_v15 = vpop.eup %3526 }
 0x587   :  { %v538_v16 = vmul.f32 %v3527_v15, %v3684_v24  ;;  %v543_v19 = vsel %vm233_vm2, %v539_v18, 0.0 }
 0x589   :  { %v540_v17 = vsel %vm233_vm2, %v538_v16, 0.0 }
 0x58a   :  { %541 = vadd.xlane.f32.xlu0 %v540_v17 }
 0x58e   :  { %544 = vadd.xlane.f32.xlu0 %v543_v19 }
 0x5a4   :  { %556 = vrot.lane.b32.xlu0 %v3668_v11, %s3629_s24 }
 0x5a8   :  { %1019 = vrot.lane.b32.xlu0 %v3668_v11, %s3631_s26 }
 0x5b3   :  { %v823_v38 = vpop.xlane.xlu1 %822 }
 0x5b4   :  { %v825_v42 = vsub.f32 %v3742_v63, %v823_v38 }
 0x5b6   :  { %v828_v43 = vmul.f32 1.442695, %v825_v42 }
 0x5b7   :  { %v851_v41 = vpop.permute.xlu1 %850 }
 0x5c7   :  { %819 = vmax.xlane.f32.xlu0 %v818_v21 }
 0x613   :  { %v542_v22 = vpop.xlane.xlu0 %541 }
 0x614   :  { %3528 = vrcp.f32 %v542_v22 }
 0x617   :  { %v545_v23 = vpop.xlane.xlu0 %544 }
 0x618   :  { %3530 = vrcp.f32 %v545_v23 }
 0x619   :  { %3532 = vpow2.f32 %v828_v43 }
 0x61b   :  { %v557_v25 = vpop.permute.xlu0 %556 }
 0x61c   :  { %3307 = vmatprep.subr.mxu1 %v557_v25 }
 0x61d   :  { %3308 = vmatpush3.msra.mxu1 %v557_v25 }
 0x61e   :  { %3312 = vmatprep.subr.mxu1 %v643_v26 }
 0x61f   :  { %v1020_v28 = vpop.permute.xlu0 %1019 }
 0x620   :  { %3340 = vmatprep.mubr.msk.f32.mxu0 %vm149_vm1, %v1020_v28 }
 0x621   :  { %v3529_v30 = vpop.eup %3528  ;;  %3341 = vmatmul.mubr.msk.f32.vlgmr.msra.gmra.mxu0 %vm149_vm1, %v1022_v29  ;;  %v48_v29 = vld [vmem:[#allocation2 + $0xb8] sm:$0xff] }
 0x622   :  { %v548_v31 = vmul.f32 %v3529_v30, %v542_v22 }
 0x624   :  { %v550_v32 = vsub.f32 2.0, %v548_v31  ;;  %v434_v31 = vadd.f32 %v3728_v57, %v48_v29  ;;  %v1227_v57 = vld [vmem:[#allocation2 + $0x38] sm:$0xff] }
 0x625   :  { %v3531_v33 = vpop.eup %3530 }
 0x626   :  { %v552_v34 = vmul.f32 %v3529_v30, %v550_v32  ;;  %v549_v35 = vmul.f32 %v3531_v33, %v545_v23  ;;  %v3533_v47 = vpop.eup %3532  ;;  %v47_v30 = vld [vmem:[#allocation2 + $0xb0] sm:$0xff] }
 0x627   :  { %v831_v51 = vmul.f32 %v3533_v47, %v3687_v27 }
 0x628   :  { %v554_v36 = vmul.f32 %v552_v34, %v538_v16  ;;  %v551_v37 = vsub.f32 2.0, %v549_v35 }
 0x629   :  { %v835_v52 = vsel %vm233_vm2, %v831_v51, 0.0 }
 0x62a   :  { %v553_v39 = vmul.f32 %v3531_v33, %v551_v37  ;;  %3309 = vmatprep.mubr.msk.f32.mxu1 %vm233_vm2, %v554_v36  ;;  %v433_v33 = vadd.f32 %v3730_v58, %v47_v30 }
 0x62c   :  { %v555_v40 = vmul.f32 %v553_v39, %v539_v18 }
 0x62e   :  { %3310 = vmatmul.mubr.msk.f32.vlgmr.msra.gmra.mxu1 %vm233_vm2, %v555_v40 }
 0x62f   :  { %3313 = vmatpush3.msra.mxu1 %v643_v26 }
 0x630   :  { %3324 = vmatprep.subr.mxu1 %v851_v41 }
 0x650   :  { %v820_v44 = vpop.xlane.xlu0 %819 }
 0x651   :  { %v824_v45 = vsub.f32 %v809_v20, %v820_v44 }
 0x653   :  { %v826_v46 = vmul.f32 1.442695, %v824_v45 }
 0x655   :  { %3534 = vpow2.f32 %v826_v46 }
 0x662   :  { %v3535_v48 = vpop.eup %3534 }
 0x663   :  { %v830_v49 = vmul.f32 %v3535_v48, %v3684_v24 }
 0x665   :  { %v832_v50 = vsel %vm233_vm2, %v830_v49, 0.0 }
 0x666   :  { %833 = vadd.xlane.f32.xlu0 %v832_v50 }
 0x66a   :  { %836 = vadd.xlane.f32.xlu0 %v835_v52 }
 0x680   :  { %848 = vrot.lane.b32.xlu0 %v3668_v11, %s3632_s27 }
 0x6e1   :  { %v3342_v53 = vpop.f32.mrf.mxu0 }
 0x6e2   :  { %v1113_v54 = vsel %vm233_vm2, %v3342_v53, -inf }
 0x6e3   :  { %v1101_v55 = vpop.f32.mrf.mxu0  ;;  %1114 = vmax.xlane.f32.xlu0 %v1113_v54 }
 0x6e4   :  { %v1110_v56 = vsel %vm233_vm2, %v1101_v55, -inf }
 0x6e5   :  { %1111 = vmax.xlane.f32.xlu1 %v1110_v56 }
 0x6ee   :  { %v3311_v59 = vpop.f32.mrf.mxu1 }
 0x6ef   :  { %v834_v60 = vpop.xlane.xlu0 %833 }
 0x6f0   :  { %3536 = vrcp.f32 %v834_v60  ;;  %v634_v61 = vpop.f32.mrf.mxu1 }
 0x6f1   :  { %3314 = vmatprep.mubr.msk.f32.mxu1 %vm149_vm1, %v634_v61 }
 0x6f2   :  { %3315 = vmatmul.mubr.msk.f32.vlgmr.msra.gmra.mxu1 %vm149_vm1, %v3311_v59 }
 0x6f3   :  { %3325 = vmatpush3.msra.mxu1 %v851_v41  ;;  %v837_v62 = vpop.xlane.xlu0 %836 }
 0x6f4   :  { %3538 = vrcp.f32 %v837_v62 }
 0x6f7   :  { %v849_v63 = vpop.permute.xlu0 %848 }
 0x6f8   :  { %3326 = vmatprep.subr.mxu1 %v849_v63 }
 0x6f9   :  { %3327 = vmatpush3.msra.mxu1 %v849_v63 }
 0x6fa   :  { %3331 = vmatprep.subr.mxu1 %v935_v14 }
 0x6fd   :  { %v3537_v0 = vpop.eup %3536 }
 0x6fe   :  { %v840_v1 = vmul.f32 %v3537_v0, %v834_v60 }
 0x700   :  { %v842_v3 = vsub.f32 2.0, %v840_v1 }
 0x701   :  { %v3539_v4 = vpop.eup %3538 }
 0x702   :  { %v844_v6 = vmul.f32 %v3537_v0, %v842_v3  ;;  %v841_v7 = vmul.f32 %v3539_v4, %v837_v62 }
 0x704   :  { %v846_v8 = vmul.f32 %v844_v6, %v830_v49  ;;  %v843_v10 = vsub.f32 2.0, %v841_v7 }
 0x706   :  { %v845_v12 = vmul.f32 %v3539_v4, %v843_v10  ;;  %3328 = vmatprep.mubr.msk.f32.mxu1 %vm233_vm2, %v846_v8 }
 0x708   :  { %v847_v13 = vmul.f32 %v845_v12, %v831_v51 }
 0x70a   :  { %3329 = vmatmul.mubr.msk.f32.vlgmr.msra.gmra.mxu1 %vm233_vm2, %v847_v13 }
 0x70b   :  { %3332 = vmatpush3.msra.mxu1 %v935_v14 }
 0x76c   :  { %v1115_v15 = vpop.xlane.xlu0 %1114 }
 0x76d   :  { %v1117_v16 = vsub.f32 %v3342_v53, %v1115_v15  ;;  %v36_v15 = vld [vmem:[#allocation2 + $0x58] sm:$0xff] }
 0x76e   :  { %v1112_v17 = vpop.xlane.xlu1 %1111  ;;  %3355 = vmatprep.subr.mxu0 %v36_v15 }
 0x76f   :  { %v1120_v18 = vmul.f32 1.442695, %v1117_v16  ;;  %v1116_v19 = vsub.f32 %v1101_v55, %v1112_v17  ;;  %3356 = vmatpush3.msra.mxu0 %v36_v15  ;;  %v34_v16 = vld [vmem:[#allocation2 + $0x48] sm:$0xff]  ;;  %v33_v17 = vld [vmem:[#allocation2 + $0x40] sm:$0xff] }
 0x771   :  { %3540 = vpow2.f32 %v1120_v18  ;;  %v1118_v20 = vmul.f32 1.442695, %v1116_v19  ;;  %v44_v18 = vld [vmem:[#allocation2 + $0x98] sm:$0xff]  ;;  %v43_v19 = vld [vmem:[#allocation2 + $0x90] sm:$0xff] }
 0x773   :  { %3542 = vpow2.f32 %v1118_v20  ;;  %v42_v20 = vld [vmem:[#allocation2 + $0x88] sm:$0xff] }
 0x77e   :  { %v3541_v21 = vpop.eup %3540 }
 0x77f   :  { %v1123_v22 = vmul.f32 %v3541_v21, %v3687_v27  ;;  %v41_v21 = vld [vmem:[#allocation2 + $0x80] sm:$0xff] }
 0x780   :  { %v3543_v23 = vpop.eup %3542 }
 0x781   :  { %v1127_v25 = vsel %vm233_vm2, %v1123_v22, 0.0  ;;  %v1122_v26 = vmul.f32 %v3543_v23, %v3684_v24 }
 0x782   :  { %1128 = vadd.xlane.f32.xlu0 %v1127_v25 }
 0x783   :  { %v1124_v28 = vsel %vm233_vm2, %v1122_v26, 0.0 }
 0x784   :  { %1125 = vadd.xlane.f32.xlu1 %v1124_v28 }
 0x795   :  { %1142 = vrot.lane.b32.xlu1 %v3666_v9, %s3633_s28 }
 0x798   :  { %1140 = vrot.lane.b32.xlu0 %v3668_v11, %s3633_s28 }
 0x7b2   :  { %v3316_v32 = vpop.f32.mrf.mxu1 }
 0x7b3   :  { %v726_v34 = vadd.f32 %v3316_v32, %v434_v31  ;;  %v54_v32 = vld [vmem:[#allocation2 + $0xe8] sm:$0xff] }
 0x7b4   :  { %v716_v35 = vpop.f32.mrf.mxu1 }
 0x7b5   :  { %v725_v36 = vadd.f32 %v716_v35, %v433_v33 }
 0x7ca   :  { %v3330_v37 = vpop.f32.mrf.mxu1 }
 0x7cc   :  { %v926_v38 = vpop.f32.mrf.mxu1 }
 0x7cd   :  { %3333 = vmatprep.mubr.msk.f32.mxu1 %vm149_vm1, %v926_v38 }
 0x7ce   :  { %3334 = vmatmul.mubr.msk.f32.vlgmr.msra.gmra.mxu1 %vm149_vm1, %v3330_v37 }
 0x80b   :  { %v1129_v9 = vpop.xlane.xlu0 %1128 }
 0x80c   :  { %3544 = vrcp.f32 %v1129_v9 }
 0x80d   :  { %v1126_v39 = vpop.xlane.xlu1 %1125 }
 0x80e   :  { %3546 = vrcp.f32 %v1126_v39 }
 0x80f   :  { %v1141_v40 = vpop.permute.xlu0 %1140 }
 0x811   :  { %v1143_v11 = vpop.permute.xlu1 %1142 }
 0x812   :  { %3343 = vmatprep.subr.mxu1 %v1143_v11 }
 0x813   :  { %3344 = vmatpush3.msra.mxu1 %v1143_v11 }
 0x814   :  { %3345 = vmatprep.subr.mxu1 %v1141_v40 }
 0x815   :  { %3346 = vmatpush3.msra.mxu1 %v1141_v40  ;;  %v40_v40 = vld [vmem:[#allocation2 + $0x78] sm:$0xff] }
 0x816   :  { %3350 = vmatprep.subr.mxu1 %v1227_v57 }
 0x819   :  { %v3545_v58 = vpop.eup %3544 }
 0x81a   :  { %v1133_v41 = vmul.f32 %v3545_v58, %v1129_v9  ;;  %v56_v9 = vld [vmem:[#allocation2 + $0xf8] sm:$0xff] }
 0x81b   :  { %v3547_v42 = vpop.eup %3546 }
 0x81c   :  { %v1135_v43 = vsub.f32 2.0, %v1133_v41  ;;  %v1132_v44 = vmul.f32 %v3547_v42, %v1126_v39  ;;  %v37_v41 = vld [vmem:[#allocation2 + $0x60] sm:$0xff] }
 0x81e   :  { %v1134_v45 = vsub.f32 2.0, %v1132_v44  ;;  %v1137_v46 = vmul.f32 %v3545_v58, %v1135_v43  ;;  %v38_v58 = vld [vmem:[#allocation2 + $0x68] sm:$0xff]  ;;  %v49_v44 = vld [vmem:[#allocation2 + $0xc0] sm:$0xff] }
 0x820   :  { %v1136_v47 = vmul.f32 %v3547_v42, %v1134_v45  ;;  %v1139_v49 = vmul.f32 %v1137_v46, %v1123_v22  ;;  %v50_v42 = vld [vmem:[#allocation2 + $0xc8] sm:$0xff] }
 0x822   :  { %v1138_v48 = vmul.f32 %v1136_v47, %v1122_v26 }
 0x824   :  { %3347 = vmatprep.mubr.msk.f32.mxu1 %vm233_vm2, %v1138_v48 }
 0x825   :  { %3348 = vmatmul.mubr.msk.f32.vlgmr.msra.gmra.mxu1 %vm233_vm2, %v1139_v49 }
 0x826   :  { %3351 = vmatpush3.msra.mxu1 %v1227_v57  ;;  %v39_v57 = vld [vmem:[#allocation2 + $0x70] sm:$0xff] }
 0x827   :  { %3366 = vmatprep.subr.mxu1 %v44_v18 }
 0x88e   :  { %v3335_v50 = vpop.f32.mrf.mxu1 }
 0x88f   :  { %v1018_v51 = vadd.f32 %v3335_v50, %v726_v34  ;;  %v53_v34 = vld [vmem:[#allocation2 + $0xe0] sm:$0xff] }
 0x890   :  { %v1008_v52 = vpop.f32.mrf.mxu1 }
 0x891   :  { %v1017_v56 = vadd.f32 %v1008_v52, %v725_v36  ;;  %v55_v36 = vld [vmem:[#allocation2 + $0xf0] sm:$0xff] }
 0x8e5   :  { %v3349_v53 = vpop.f32.mrf.mxu1 }
 0x8e7   :  { %v1218_v54 = vpop.f32.mrf.mxu1 }
 0x8e8   :  { %3352 = vmatprep.mubr.msk.f32.mxu1 %vm149_vm1, %v1218_v54  ;;  %v51_v54 = vld [vmem:[#allocation2 + $0xd0] sm:$0xff] }
 0x8e9   :  { %3353 = vmatmul.mubr.msk.f32.vlgmr.msra.gmra.mxu1 %vm149_vm1, %v3349_v53 }
 0x8ea   :  { %3367 = vmatpush3.msra.mxu1 %v44_v18 }
 0x8eb   :  { %3368 = vmatprep.subr.mxu1 %v43_v19 }
 0x8ec   :  { %3369 = vmatpush3.msra.mxu1 %v43_v19 }
 0x8ed   :  { %3370 = vmatprep.subr.mxu1 %v42_v20 }
 0x8ee   :  { %3371 = vmatpush3.msra.mxu1 %v42_v20 }
 0x8ef   :  { %3372 = vmatprep.subr.mxu1 %v41_v21 }
 0x8f0   :  { %3373 = vmatpush3.msra.mxu1 %v41_v21 }
 0x8f1   :  { %3374 = vmatprep.subr.mxu1 %v40_v40 }
 0x8f2   :  { %3375 = vmatpush3.msra.mxu1 %v40_v40 }
 0x8f3   :  { %3376 = vmatprep.subr.mxu1 %v39_v57 }
 0x8f4   :  { %3377 = vmatpush3.msra.mxu1 %v39_v57 }
 0x8f5   :  { %3378 = vmatprep.subr.mxu1 %v38_v58 }
 0x8f6   :  { %3379 = vmatpush3.msra.mxu1 %v38_v58 }
 0x8f7   :  { %3380 = vmatprep.subr.mxu1 %v37_v41 }
 0x8f8   :  { %3381 = vmatpush3.msra.mxu1 %v37_v41 }
 0x9a9   :  { %v3354_v55 = vpop.f32.mrf.mxu1 }
 0x9aa   :  { %v1310_v59 = vadd.f32 %v3354_v55, %v1018_v51  ;;  %v52_v51 = vld [vmem:[#allocation2 + $0xd8] sm:$0xff] }
 0x9ab   :  { %v1300_v60 = vpop.f32.mrf.mxu1 }
 0x9ac   :  { %v1309_v61 = vadd.f32 %v1300_v60, %v1017_v56  ;;  %v1312_v62 = vadd.f32 %v1310_v59, %v3662_v5 }
 0x9ae   :  { %v1316_v63 = vsel %vm61_vm0, %v1312_v62, 0.0  ;;  %v1311_v0 = vadd.f32 %v1309_v61, %v3655_v2  ;;  %v35_v2 = vld [vmem:[#allocation2 + $0x50] sm:$0xff] }
 0x9af   :  { %1317 = vadd.xlane.f32.xlu0 %v1316_v63  ;;  %3357 = vmatprep.subr.mxu0 %v35_v2 }
 0x9b0   :  { %v1313_v1 = vsel %vm61_vm0, %v1311_v0, 0.0  ;;  %3358 = vmatpush3.msra.mxu0 %v35_v2 }
 0x9b1   :  { %1314 = vadd.xlane.f32.xlu1 %v1313_v1  ;;  %3359 = vmatprep.subr.mxu0 %v34_v16 }
 0x9b2   :  { %3360 = vmatpush3.msra.mxu0 %v34_v16 }
 0x9b3   :  { %3361 = vmatprep.subr.mxu0 %v33_v17 }
 0x9b4   :  { %3362 = vmatpush3.msra.mxu0 %v33_v17 }
 0xa38   :  { %v1318_v3 = vpop.xlane.xlu0 %1317 }
 0xa39   :  { %v1321_v4 = vmul.f32 0.03125, %v1318_v3 }
 0xa3a   :  { %v1315_v6 = vpop.xlane.xlu1 %1314 }
 0xa3b   :  { %v1323_v7 = vsub.f32 %v1312_v62, %v1321_v4  ;;  %v1320_v8 = vmul.f32 0.03125, %v1315_v6 }
 0xa3d   :  { %v1322_v10 = vsub.f32 %v1311_v0, %v1320_v8  ;;  %v1325_v12 = vmul.f32 %v1323_v7, %v1323_v7 }
 0xa3f   :  { %v1329_v13 = vsel %vm61_vm0, %v1325_v12, 0.0  ;;  %v1324_v14 = vmul.f32 %v1322_v10, %v1322_v10  ;;  %v1547_v12 = vld [vmem:[#allocation2 + $0x148] sm:$0xff] }
 0xa40   :  { %1330 = vadd.xlane.f32.xlu0 %v1329_v13  ;;  %v1546_v13 = vld [vmem:[#allocation2 + $0x140] sm:$0xff]  ;;  %3385 = vmatprep.subr.mxu0 %v1547_v12 }
 0xa41   :  { %v1326_v5 = vsel %vm61_vm0, %v1324_v14, 0.0  ;;  %v1545_v14 = vld [vmem:[#allocation2 + $0x138] sm:$0xff] }
 0xa42   :  { %1327 = vadd.xlane.f32.xlu1 %v1326_v5  ;;  %v1544_v5 = vld [vmem:[#allocation2 + $0x130] sm:$0xff] }
 0xac9   :  { %v1331_v22 = vpop.xlane.xlu0 %1330 }
 0xaca   :  { %v1333_v23 = vmul.f32 0.03125, %v1331_v22  ;;  %v58_v22 = vld [vmem:[#allocation2 + $0x108] sm:$0xff] }
 0xacb   :  { %v1328_v25 = vpop.xlane.xlu1 %1327 }
 0xacc   :  { %v1335_v26 = vadd.f32 1e-05, %v1333_v23  ;;  %v1332_v28 = vmul.f32 0.03125, %v1328_v25  ;;  %v57_v25 = vld [vmem:[#allocation2 + $0x100] sm:$0xff] }
 0xace   :  { %3548 = vrsqrt.f32 %v1335_v26  ;;  %v1334_v29 = vadd.f32 1e-05, %v1332_v28  ;;  %v59_v28 = vld [vmem:[#allocation2 + $0x110] sm:$0xff] }
 0xad0   :  { %3550 = vrsqrt.f32 %v1334_v29 }
 0xadb   :  { %v3549_v30 = vpop.eup %3548 }
 0xadc   :  { %v1339_v31 = vmul.f32 %v3549_v30, %v1323_v7 }
 0xadd   :  { %v3551_v33 = vpop.eup %3550 }
 0xade   :  { %v1338_v35 = vmul.f32 %v3551_v33, %v1322_v10  ;;  %v1341_v37 = vmul.f32 %v1339_v31, %v54_v32  ;;  %v60_v31 = vld [vmem:[#allocation2 + $0x118] sm:$0xff] }
 0xae0   :  { %v1340_v38 = vmul.f32 %v1338_v35, %v53_v34  ;;  %v1343_v11 = vadd.f32 %v1341_v37, %v56_v9  ;;  %v1561_v34 = vld [vmem:[#allocation2 + $0x1d8] sm:$0xff] }
 0xae2   :  { %v1342_v39 = vadd.f32 %v1340_v38, %v55_v36  ;;  %v1560_v36 = vld [vmem:[#allocation2 + $0x1d0] sm:$0xff] }
 0xae4   :  { %3363 = vmatprep.mubr.msk.f32.mxu0 %vm61_vm0, %v1342_v39 }
 0xae5   :  { %3364 = vmatmul.mubr.msk.f32.vlgmr.msra.gmra.mxu0 %vm61_vm0, %v1343_v11 }
 0xae6   :  { %3386 = vmatpush3.msra.mxu0 %v1547_v12  ;;  %v1863_v12 = vld [vmem:[#allocation2 + $0x150] sm:$0xff] }
 0xae7   :  { %3387 = vmatprep.subr.mxu0 %v1546_v13 }
 0xae8   :  { %3388 = vmatpush3.msra.mxu0 %v1546_v13 }
 0xae9   :  { %3389 = vmatprep.subr.mxu0 %v1545_v14 }
 0xaea   :  { %3390 = vmatpush3.msra.mxu0 %v1545_v14 }
 0xaeb   :  { %3391 = vmatprep.subr.mxu0 %v1544_v5 }
 0xaec   :  { %3392 = vmatpush3.msra.mxu0 %v1544_v5 }
 0xba5   :  { %v3365_v43 = vpop.f32.mrf.mxu0 }
 0xba6   :  { %v1422_v45 = vadd.f32 %v3365_v43, %v50_v42 }
 0xba7   :  { %v1416_v46 = vpop.f32.mrf.mxu0 }
 0xba8   :  { %v1417_v47 = vadd.f32 %v1416_v46, %v49_v44  ;;  %v1426_v49 = vmax.f32 %v1422_v45, 0.0 }
 0xbaa   :  { %v1425_v48 = vmax.f32 %v1417_v47, 0.0 }
 0xbac   :  { %3382 = vmatprep.mubr.msk.f32.mxu1 %vm1427_vm3, %v1425_v48 }
 0xbad   :  { %3383 = vmatmul.mubr.msk.f32.vlgmr.msra.gmra.mxu1 %vm1427_vm3, %v1426_v49 }
 0xc6d   :  { %v3384_v50 = vpop.f32.mrf.mxu1 }
 0xc6e   :  { %v1510_v52 = vadd.f32 %v3384_v50, %v1343_v11 }
 0xc6f   :  { %v1500_v53 = vpop.f32.mrf.mxu1 }
 0xc70   :  { %v1509_v55 = vadd.f32 %v1500_v53, %v1342_v39  ;;  %v1512_v56 = vadd.f32 %v1510_v52, %v52_v51 }
 0xc72   :  { %v1516_v59 = vsel %vm61_vm0, %v1512_v56, 0.0  ;;  %v1511_v60 = vadd.f32 %v1509_v55, %v51_v54 }
 0xc73   :  { %1517 = vadd.xlane.f32.xlu0 %v1516_v59 }
 0xc74   :  { %v1513_v61 = vsel %vm61_vm0, %v1511_v60, 0.0 }
 0xc75   :  { %1514 = vadd.xlane.f32.xlu1 %v1513_v61 }
 0xcfc   :  { %v1518_v62 = vpop.xlane.xlu0 %1517 }
 0xcfd   :  { %v1520_v63 = vmul.f32 0.03125, %v1518_v62 }
 0xcfe   :  { %v1515_v0 = vpop.xlane.xlu1 %1514 }
 0xcff   :  { %v1522_v1 = vsub.f32 %v1512_v56, %v1520_v63  ;;  %v1519_v3 = vmul.f32 0.03125, %v1515_v0 }
 0xd01   :  { %v1521_v4 = vsub.f32 %v1511_v60, %v1519_v3  ;;  %v1524_v6 = vmul.f32 %v1522_v1, %v1522_v1 }
 0xd03   :  { %v1528_v7 = vsel %vm61_vm0, %v1524_v6, 0.0  ;;  %v1523_v8 = vmul.f32 %v1521_v4, %v1521_v4 }
 0xd04   :  { %1529 = vadd.xlane.f32.xlu0 %v1528_v7 }
 0xd05   :  { %v1525_v10 = vsel %vm61_vm0, %v1523_v8, 0.0 }
 0xd06   :  { %1526 = vadd.xlane.f32.xlu1 %v1525_v10 }
 0xd8d   :  { %v1530_v15 = vpop.xlane.xlu0 %1529 }
 0xd8e   :  { %v1532_v2 = vmul.f32 0.03125, %v1530_v15 }
 0xd8f   :  { %v1527_v16 = vpop.xlane.xlu1 %1526 }
 0xd90   :  { %v1534_v17 = vadd.f32 1e-05, %v1532_v2  ;;  %v1531_v18 = vmul.f32 0.03125, %v1527_v16 }
 0xd92   :  { %3552 = vrsqrt.f32 %v1534_v17  ;;  %v1533_v19 = vadd.f32 1e-05, %v1531_v18 }
 0xd94   :  { %3554 = vrsqrt.f32 %v1533_v19 }
 0xd9f   :  { %v3553_v20 = vpop.eup %3552 }
 0xda0   :  { %v1538_v21 = vmul.f32 %v3553_v20, %v1522_v1 }
 0xda1   :  { %v3555_v23 = vpop.eup %3554 }
 0xda2   :  { %v1537_v26 = vmul.f32 %v3555_v23, %v1521_v4  ;;  %v1540_v29 = vmul.f32 %v1538_v21, %v58_v22 }
 0xda4   :  { %v1539_v30 = vmul.f32 %v1537_v26, %v57_v25  ;;  %v3810_v33 = vadd.f32 %v1540_v29, %v60_v31 }
 0xda6   :  { %v3808_v32 = vadd.f32 %v1539_v30, %v59_v28 }
 0xda8   :  { %3393 = vmatprep.mubr.msk.f32.mxu0 %vm61_vm0, %v3808_v32 }
 0xda9   :  { %3394 = vmatmul.mubr.msk.f32.vlgmr.msra.gmra.mxu0 %vm61_vm0, %v3810_v33 }
 0xe69   :  { %v3395_v35 = vpop.f32.mrf.mxu0 }
 0xe6a   :  { %v3816_v37 = vadd.f32 %v3395_v35, %v1561_v34  ;;  %v3893_v34 = vld [vmem:[#allocation2 + $0x120] sm:$0xff] }
 0xe6b   :  { %v1648_v38 = vpop.f32.mrf.mxu0 }
 0xe6c   :  { %v3818_v9 = vadd.f32 %v1648_v38, %v1560_v36  ;;  %1661 = vrot.lane.b32.xlu1 %v3816_v37, %s3623_s19  ;;  %v3897_v38 = vld [vmem:[#allocation2 + $0x128] sm:$0xff] }
 0xe6e   :  { %1659 = vrot.lane.b32.xlu0 %v3818_v9, %s3623_s19  ;;  %3400 = vmatprep.mubr.msk.f32.mxu0 %vm149_vm1, %v3818_v9 }
 0xe70   :  { %1953 = vrot.lane.b32.xlu1 %v3816_v37, %s3626_s21 }
 0xe72   :  { %1947 = vrot.lane.b32.xlu0 %v3818_v9, %s3625_s20 }
 0xe74   :  { %1951 = vrot.lane.b32.xlu1 %v3818_v9, %s3626_s21 }
 0xe78   :  { %1949 = vrot.lane.b32.xlu1 %v3816_v37, %s3625_s20 }
 0xede   :  { %v1662_v39 = vpop.permute.xlu1 %1661 }
 0xedf   :  { %3396 = vmatprep.subr.msk.mxu0 %vm149_vm1, %v1662_v39 }
 0xee0   :  { %3397 = vmatpush3.xpose.msk.msra.mxu0 %vm149_vm1, %v1662_v39  ;;  %v1660_v11 = vpop.permute.xlu0 %1659 }
 0xee1   :  { %3398 = vmatprep.subr.msk.mxu0 %vm149_vm1, %v1660_v11 }
 0xee2   :  { %v1954_v40 = vpop.permute.xlu1 %1953 }
 0xee4   :  { %3399 = vmatpush3.xpose.msk.msra.mxu0 %vm149_vm1, %v1660_v11  ;;  %v1948_v57 = vpop.permute.xlu0 %1947 }
 0xee5   :  { %3415 = vmatprep.subr.msk.mxu0 %vm149_vm1, %v1954_v40 }
 0xee6   :  { %v1952_v58 = vpop.permute.xlu1 %1951 }
 0xee7   :  { %3401 = vmatmul.mubr.msk.f32.vlgmr.msra.gmra.mxu0 %vm149_vm1, %v3816_v37 }
 0xee8   :  { %3416 = vmatpush3.xpose.msk.msra.mxu0 %vm149_vm1, %v1954_v40  ;;  %3419 = vmatprep.mubr.msk.f32.mxu0 %vm149_vm1, %v1948_v57 }
 0xee9   :  { %3417 = vmatprep.subr.msk.mxu0 %vm149_vm1, %v1952_v58 }
 0xeea   :  { %v1950_v41 = vpop.permute.xlu1 %1949 }
 0xeec   :  { %3418 = vmatpush3.xpose.msk.msra.mxu0 %vm149_vm1, %v1952_v58 }
 0xeef   :  { %3420 = vmatmul.mubr.msk.f32.vlgmr.msra.gmra.mxu0 %vm149_vm1, %v1950_v41 }
 0xfa7   :  { %v3402_v42 = vpop.f32.mrf.mxu0 }
 0xfa8   :  { %v1749_v43 = vsel %vm233_vm2, %v3402_v42, -inf }
 0xfa9   :  { %1750 = vmax.xlane.f32.xlu1 %v1749_v43  ;;  %v1737_v44 = vpop.f32.mrf.mxu0 }
 0xfaa   :  { %v1746_v45 = vsel %vm233_vm2, %v1737_v44, -inf }
 0xfab   :  { %1747 = vmax.xlane.f32.xlu0 %v1746_v45 }
 0xfaf   :  { %v3856_v46 = vpop.f32.mrf.mxu0 }
 0xfb0   :  { %v2041_v47 = vsel %vm233_vm2, %v3856_v46, -inf }
 0xfba   :  { %1778 = vrot.lane.b32.xlu1 %v3816_v37, %s3624_s0 }
 0xfbe   :  { %2245 = vrot.lane.b32.xlu1 %v3816_v37, %s3627_s22 }
 0xfc2   :  { %2243 = vrot.lane.b32.xlu1 %v3818_v9, %s3627_s22 }
 0xfc6   :  { %2241 = vrot.lane.b32.xlu1 %v3816_v37, %s3628_s23 }
 0xfea   :  { %2042 = vmax.xlane.f32.xlu1 %v2041_v47  ;;  %v2155_v47 = vld [vmem:[#allocation2 + $0x158] sm:$0xff] }
 0xffb   :  { %2070 = vrot.lane.b32.xlu1 %v3816_v37, %s3629_s24 }
 0xfff   :  { %2537 = vrot.lane.b32.xlu1 %v3816_v37, %s3630_s25 }
0x1003   :  { %2535 = vrot.lane.b32.xlu1 %v3818_v9, %s3630_s25 }
0x1007   :  { %2533 = vrot.lane.b32.xlu1 %v3816_v37, %s3631_s26 }
0x1032   :  { %v1751_v48 = vpop.xlane.xlu1 %1750 }
0x1033   :  { %v1753_v49 = vsub.f32 %v3402_v42, %v1751_v48 }
0x1034   :  { %v1748_v50 = vpop.xlane.xlu0 %1747 }
0x1035   :  { %v1756_v51 = vmul.f32 1.442695, %v1753_v49  ;;  %v1752_v52 = vsub.f32 %v1737_v44, %v1748_v50 }
0x1036   :  { %v1779_v53 = vpop.permute.xlu1 %1778 }
0x1037   :  { %v1754_v54 = vmul.f32 1.442695, %v1752_v52  ;;  %3403 = vmatprep.subr.mxu1 %v1779_v53  ;;  %3556 = vpow2.f32 %v1756_v51 }
0x1038   :  { %3404 = vmatpush3.msra.mxu1 %v1779_v53 }
0x1039   :  { %3558 = vpow2.f32 %v1754_v54 }
0x103a   :  { %v2246_v55 = vpop.permute.xlu1 %2245 }
0x103b   :  { %3434 = vmatprep.subr.msk.mxu0 %vm149_vm1, %v2246_v55 }
0x103c   :  { %3435 = vmatpush3.xpose.msk.msra.mxu0 %vm149_vm1, %v2246_v55 }
0x103e   :  { %v2244_v56 = vpop.permute.xlu1 %2243 }
0x103f   :  { %3436 = vmatprep.subr.msk.mxu0 %vm149_vm1, %v2244_v56 }
0x1040   :  { %3437 = vmatpush3.xpose.msk.msra.mxu0 %vm149_vm1, %v2244_v56 }
0x1042   :  { %v2242_v1 = vpop.permute.xlu1 %2241 }
0x1044   :  { %v3557_v59 = vpop.eup %3556 }
0x1045   :  { %v1759_v63 = vmul.f32 %v3557_v59, %v3687_v27 }
0x1046   :  { %v3559_v60 = vpop.eup %3558 }
0x1047   :  { %v1758_v61 = vmul.f32 %v3559_v60, %v3684_v24  ;;  %v1763_v0 = vsel %vm233_vm2, %v1759_v63, 0.0  ;;  %v2029_v24 = vpop.f32.mrf.mxu0 }
0x1048   :  { %v2038_v27 = vsel %vm233_vm2, %v2029_v24, -inf }
0x1049   :  { %v1760_v62 = vsel %vm233_vm2, %v1758_v61, 0.0 }
0x104a   :  { %1761 = vadd.xlane.f32.xlu0 %v1760_v62 }
0x104e   :  { %1764 = vadd.xlane.f32.xlu0 %v1763_v0 }
0x1064   :  { %1776 = vrot.lane.b32.xlu0 %v3818_v9, %s3624_s0 }
0x1068   :  { %2239 = vrot.lane.b32.xlu0 %v3818_v9, %s3628_s23 }
0x1073   :  { %v2043_v3 = vpop.xlane.xlu1 %2042 }
0x1074   :  { %v2045_v23 = vsub.f32 %v3856_v46, %v2043_v3 }
0x1076   :  { %v2048_v25 = vmul.f32 1.442695, %v2045_v23 }
0x1077   :  { %v3880_v4 = vpop.permute.xlu1 %2070 }
0x107b   :  { %v2538_v6 = vpop.permute.xlu1 %2537 }
0x107c   :  { %3453 = vmatprep.subr.msk.mxu0 %vm149_vm1, %v2538_v6 }
0x107f   :  { %v2536_v5 = vpop.permute.xlu1 %2535 }
0x1083   :  { %v2534_v49 = vpop.permute.xlu1 %2533 }
0x1087   :  { %2039 = vmax.xlane.f32.xlu0 %v2038_v27 }
0x10d3   :  { %v1762_v7 = vpop.xlane.xlu0 %1761 }
0x10d4   :  { %3560 = vrcp.f32 %v1762_v7 }
0x10d7   :  { %v1765_v8 = vpop.xlane.xlu0 %1764 }
0x10d8   :  { %3562 = vrcp.f32 %v1765_v8 }
0x10d9   :  { %3564 = vpow2.f32 %v2048_v25 }
0x10db   :  { %v1777_v10 = vpop.permute.xlu0 %1776 }
0x10dc   :  { %3405 = vmatprep.subr.mxu1 %v1777_v10 }
0x10dd   :  { %3406 = vmatpush3.msra.mxu1 %v1777_v10 }
0x10de   :  { %3410 = vmatprep.subr.mxu1 %v1863_v12 }
0x10df   :  { %v2240_v13 = vpop.permute.xlu0 %2239 }
0x10e0   :  { %3438 = vmatprep.mubr.msk.f32.mxu0 %vm149_vm1, %v2240_v13 }
0x10e1   :  { %v3561_v14 = vpop.eup %3560  ;;  %3439 = vmatmul.mubr.msk.f32.vlgmr.msra.gmra.mxu0 %vm149_vm1, %v2242_v1 }
0x10e2   :  { %v1768_v15 = vmul.f32 %v3561_v14, %v1762_v7  ;;  %3454 = vmatpush3.xpose.msk.msra.mxu0 %vm149_vm1, %v2538_v6 }
0x10e3   :  { %3455 = vmatprep.subr.msk.mxu0 %vm149_vm1, %v2536_v5 }
0x10e4   :  { %v1770_v2 = vsub.f32 2.0, %v1768_v15 }
0x10e5   :  { %v3563_v16 = vpop.eup %3562 }
0x10e6   :  { %v1772_v17 = vmul.f32 %v3561_v14, %v1770_v2  ;;  %v1769_v18 = vmul.f32 %v3563_v16, %v1765_v8  ;;  %3456 = vmatpush3.xpose.msk.msra.mxu0 %vm149_vm1, %v2536_v5  ;;  %v3565_v30 = vpop.eup %3564 }
0x10e7   :  { %v2051_v39 = vmul.f32 %v3897_v38, %v3565_v30 }
0x10e8   :  { %v1774_v19 = vmul.f32 %v1772_v17, %v1758_v61  ;;  %v1771_v20 = vsub.f32 2.0, %v1769_v18 }
0x10e9   :  { %v2055_v11 = vsel %vm233_vm2, %v2051_v39, 0.0 }
0x10ea   :  { %v1773_v21 = vmul.f32 %v3563_v16, %v1771_v20  ;;  %3407 = vmatprep.mubr.msk.f32.mxu1 %vm233_vm2, %v1774_v19 }
0x10ec   :  { %v1775_v22 = vmul.f32 %v1773_v21, %v1759_v63 }
0x10ee   :  { %3408 = vmatmul.mubr.msk.f32.vlgmr.msra.gmra.mxu1 %vm233_vm2, %v1775_v22 }
0x10ef   :  { %3411 = vmatpush3.msra.mxu1 %v1863_v12 }
0x10f0   :  { %3422 = vmatprep.subr.mxu1 %v3880_v4 }
0x1110   :  { %v2040_v26 = vpop.xlane.xlu0 %2039 }
0x1111   :  { %v2044_v28 = vsub.f32 %v2029_v24, %v2040_v26 }
0x1113   :  { %v2046_v29 = vmul.f32 1.442695, %v2044_v28 }
0x1115   :  { %3566 = vpow2.f32 %v2046_v29 }
0x1122   :  { %v3567_v31 = vpop.eup %3566 }
0x1123   :  { %v2050_v35 = vmul.f32 %v3893_v34, %v3567_v31 }
0x1125   :  { %v2052_v36 = vsel %vm233_vm2, %v2050_v35, 0.0 }
0x1126   :  { %2053 = vadd.xlane.f32.xlu0 %v2052_v36 }
0x112a   :  { %2056 = vadd.xlane.f32.xlu0 %v2055_v11 }
0x1140   :  { %2068 = vrot.lane.b32.xlu0 %v3818_v9, %s3629_s24 }
0x1144   :  { %2531 = vrot.lane.b32.xlu0 %v3818_v9, %s3631_s26 }
0x11a1   :  { %v3440_v40 = vpop.f32.mrf.mxu0 }
0x11a2   :  { %v2333_v57 = vsel %vm233_vm2, %v3440_v40, -inf }
0x11a3   :  { %2334 = vmax.xlane.f32.xlu1 %v2333_v57  ;;  %v2321_v58 = vpop.f32.mrf.mxu0 }
0x11a4   :  { %v2330_v41 = vsel %vm233_vm2, %v2321_v58, -inf }
0x11a5   :  { %2331 = vmax.xlane.f32.xlu0 %v2330_v41 }
0x11ae   :  { %v3409_v42 = vpop.f32.mrf.mxu1 }
0x11af   :  { %v2054_v43 = vpop.xlane.xlu0 %2053 }
0x11b0   :  { %3568 = vrcp.f32 %v2054_v43  ;;  %v1854_v44 = vpop.f32.mrf.mxu1 }
0x11b1   :  { %3412 = vmatprep.mubr.msk.f32.mxu1 %vm149_vm1, %v1854_v44 }
0x11b2   :  { %3413 = vmatmul.mubr.msk.f32.vlgmr.msra.gmra.mxu1 %vm149_vm1, %v3409_v42 }
0x11b3   :  { %3423 = vmatpush3.msra.mxu1 %v3880_v4  ;;  %v2057_v45 = vpop.xlane.xlu0 %2056 }
0x11b4   :  { %3570 = vrcp.f32 %v2057_v45  ;;  %2362 = vrot.lane.b32.xlu1 %v3816_v37, %s3632_s27 }
0x11b7   :  { %v2069_v46 = vpop.permute.xlu0 %2068 }
0x11b8   :  { %3424 = vmatprep.subr.mxu1 %v2069_v46 }
0x11b9   :  { %3425 = vmatpush3.msra.mxu1 %v2069_v46 }
0x11ba   :  { %3429 = vmatprep.subr.mxu1 %v2155_v47 }
0x11bb   :  { %v2532_v48 = vpop.permute.xlu0 %2531 }
0x11bc   :  { %3457 = vmatprep.mubr.msk.f32.mxu0 %vm149_vm1, %v2532_v48  ;;  %v2447_v48 = vld [vmem:[#allocation2 + $0x160] sm:$0xff] }
0x11bd   :  { %v3569_v50 = vpop.eup %3568  ;;  %3458 = vmatmul.mubr.msk.f32.vlgmr.msra.gmra.mxu0 %vm149_vm1, %v2534_v49  ;;  %v1563_v49 = vld [vmem:[#allocation2 + $0x1e8] sm:$0xff] }
0x11be   :  { %v2060_v51 = vmul.f32 %v3569_v50, %v2054_v43 }
0x11c0   :  { %v2062_v52 = vsub.f32 2.0, %v2060_v51 }
0x11c1   :  { %v3571_v53 = vpop.eup %3570 }
0x11c2   :  { %v2064_v54 = vmul.f32 %v3569_v50, %v2062_v52  ;;  %v2061_v55 = vmul.f32 %v3571_v53, %v2057_v45 }
0x11c4   :  { %v2066_v56 = vmul.f32 %v2064_v54, %v2050_v35  ;;  %v2063_v59 = vsub.f32 2.0, %v2061_v55 }
0x11c6   :  { %v2065_v60 = vmul.f32 %v3571_v53, %v2063_v59  ;;  %3426 = vmatprep.mubr.msk.f32.mxu1 %vm233_vm2, %v2066_v56 }
0x11c8   :  { %v2067_v61 = vmul.f32 %v2065_v60, %v2051_v39 }
0x11ca   :  { %3427 = vmatmul.mubr.msk.f32.vlgmr.msra.gmra.mxu1 %vm233_vm2, %v2067_v61 }
0x11cb   :  { %3430 = vmatpush3.msra.mxu1 %v2155_v47 }
0x122c   :  { %v2335_v62 = vpop.xlane.xlu1 %2334 }
0x122d   :  { %v2337_v63 = vsub.f32 %v3440_v40, %v2335_v62 }
0x122e   :  { %v2332_v0 = vpop.xlane.xlu0 %2331 }
0x122f   :  { %v2340_v1 = vmul.f32 1.442695, %v2337_v63  ;;  %v2336_v3 = vsub.f32 %v2321_v58, %v2332_v0 }
0x1230   :  { %v2363_v4 = vpop.permute.xlu1 %2362 }
0x1231   :  { %v2338_v6 = vmul.f32 1.442695, %v2336_v3  ;;  %3441 = vmatprep.subr.mxu1 %v2363_v4  ;;  %3572 = vpow2.f32 %v2340_v1 }
0x1233   :  { %3574 = vpow2.f32 %v2338_v6  ;;  %v2739_v6 = vld [vmem:[#allocation2 + $0x168] sm:$0xff] }
0x123e   :  { %v3573_v24 = vpop.eup %3572 }
0x123f   :  { %v2343_v10 = vmul.f32 %v3897_v38, %v3573_v24  ;;  %v1562_v24 = vld [vmem:[#allocation2 + $0x1e0] sm:$0xff] }
0x1240   :  { %v3575_v27 = vpop.eup %3574 }
0x1241   :  { %v2342_v7 = vmul.f32 %v3893_v34, %v3575_v27  ;;  %v2347_v12 = vsel %vm233_vm2, %v2343_v10, 0.0 }
0x1243   :  { %v2344_v8 = vsel %vm233_vm2, %v2342_v7, 0.0 }
0x1244   :  { %2345 = vadd.xlane.f32.xlu0 %v2344_v8 }
0x1248   :  { %2348 = vadd.xlane.f32.xlu0 %v2347_v12 }
0x125e   :  { %2360 = vrot.lane.b32.xlu0 %v3818_v9, %s3632_s27 }
0x1272   :  { %v3414_v2 = vpop.f32.mrf.mxu1 }
0x1274   :  { %v3924_v16 = vpop.f32.mrf.mxu1 }
0x1275   :  { %v1945_v27 = vadd.f32 %v3924_v16, %v1562_v24 }
0x127d   :  { %v3459_v13 = vpop.f32.mrf.mxu0 }
0x127e   :  { %v2625_v14 = vsel %vm233_vm2, %v3459_v13, -inf }
0x127f   :  { %v2613_v5 = vpop.f32.mrf.mxu0  ;;  %2626 = vmax.xlane.f32.xlu0 %v2625_v14 }
0x1280   :  { %v2622_v15 = vsel %vm233_vm2, %v2613_v5, -inf }
0x1281   :  { %2623 = vmax.xlane.f32.xlu1 %v2622_v15 }
0x128a   :  { %v3428_v17 = vpop.f32.mrf.mxu1 }
0x128c   :  { %v2146_v18 = vpop.f32.mrf.mxu1 }
0x128d   :  { %3431 = vmatprep.mubr.msk.f32.mxu1 %vm149_vm1, %v2146_v18 }
0x128e   :  { %3432 = vmatmul.mubr.msk.f32.vlgmr.msra.gmra.mxu1 %vm149_vm1, %v3428_v17 }
0x128f   :  { %3442 = vmatpush3.msra.mxu1 %v2363_v4 }
0x12cd   :  { %v2346_v19 = vpop.xlane.xlu0 %2345 }
0x12ce   :  { %3576 = vrcp.f32 %v2346_v19 }
0x12d1   :  { %v2349_v20 = vpop.xlane.xlu0 %2348 }
0x12d2   :  { %3578 = vrcp.f32 %v2349_v20 }
0x12d5   :  { %v2361_v21 = vpop.permute.xlu0 %2360 }
0x12d6   :  { %3443 = vmatprep.subr.mxu1 %v2361_v21 }
0x12d7   :  { %3444 = vmatpush3.msra.mxu1 %v2361_v21 }
0x12d8   :  { %3448 = vmatprep.subr.mxu1 %v2447_v48 }
0x12db   :  { %v3577_v22 = vpop.eup %3576 }
0x12dc   :  { %v2352_v23 = vmul.f32 %v3577_v22, %v2346_v19 }
0x12de   :  { %v2354_v25 = vsub.f32 2.0, %v2352_v23 }
0x12df   :  { %v3579_v26 = vpop.eup %3578 }
0x12e0   :  { %v2356_v28 = vmul.f32 %v3577_v22, %v2354_v25  ;;  %v2353_v29 = vmul.f32 %v3579_v26, %v2349_v20 }
0x12e2   :  { %v2358_v30 = vmul.f32 %v2356_v28, %v2342_v7  ;;  %v2355_v31 = vsub.f32 2.0, %v2353_v29 }
0x12e4   :  { %v2357_v35 = vmul.f32 %v3579_v26, %v2355_v31  ;;  %3445 = vmatprep.mubr.msk.f32.mxu1 %vm233_vm2, %v2358_v30 }
0x12e6   :  { %v2359_v36 = vmul.f32 %v2357_v35, %v2343_v10 }
0x12e8   :  { %3446 = vmatmul.mubr.msk.f32.vlgmr.msra.gmra.mxu1 %vm233_vm2, %v2359_v36  ;;  %v1551_v36 = vld [vmem:[#allocation2 + $0x188] sm:$0xff] }
0x12e9   :  { %3449 = vmatpush3.msra.mxu1 %v2447_v48  ;;  %3472 = vmatprep.subr.mxu0 %v1551_v36 }
0x12ea   :  { %3473 = vmatpush3.msra.mxu0 %v1551_v36 }
0x1308   :  { %v2627_v39 = vpop.xlane.xlu0 %2626 }
0x1309   :  { %v2629_v11 = vsub.f32 %v3459_v13, %v2627_v39  ;;  %v1549_v39 = vld [vmem:[#allocation2 + $0x178] sm:$0xff] }
0x130a   :  { %v2624_v40 = vpop.xlane.xlu1 %2623 }
0x130b   :  { %v2632_v57 = vmul.f32 1.442695, %v2629_v11  ;;  %v2628_v58 = vsub.f32 %v2613_v5, %v2624_v40  ;;  %v1548_v11 = vld [vmem:[#allocation2 + $0x170] sm:$0xff]  ;;  %v1559_v40 = vld [vmem:[#allocation2 + $0x1c8] sm:$0xff] }
0x130d   :  { %3580 = vpow2.f32 %v2632_v57  ;;  %v2630_v41 = vmul.f32 1.442695, %v2628_v58  ;;  %v1558_v57 = vld [vmem:[#allocation2 + $0x1c0] sm:$0xff]  ;;  %v1557_v58 = vld [vmem:[#allocation2 + $0x1b8] sm:$0xff] }
0x130f   :  { %3582 = vpow2.f32 %v2630_v41  ;;  %v1556_v41 = vld [vmem:[#allocation2 + $0x1b0] sm:$0xff] }
0x131a   :  { %v3581_v42 = vpop.eup %3580 }
0x131b   :  { %v2635_v43 = vmul.f32 %v3897_v38, %v3581_v42  ;;  %v1946_v38 = vadd.f32 %v3414_v2, %v1563_v49 }
0x131c   :  { %v3583_v44 = vpop.eup %3582 }
0x131d   :  { %v2639_v45 = vsel %vm233_vm2, %v2635_v43, 0.0  ;;  %v2634_v46 = vmul.f32 %v3893_v34, %v3583_v44 }
0x131e   :  { %2640 = vadd.xlane.f32.xlu0 %v2639_v45 }
0x131f   :  { %v2636_v47 = vsel %vm233_vm2, %v2634_v46, 0.0 }
0x1320   :  { %2637 = vadd.xlane.f32.xlu1 %v2636_v47 }
0x1331   :  { %2654 = vrot.lane.b32.xlu1 %v3816_v37, %s3633_s28 }
0x1334   :  { %2652 = vrot.lane.b32.xlu0 %v3818_v9, %s3633_s28 }
0x134e   :  { %v3433_v50 = vpop.f32.mrf.mxu1 }
0x134f   :  { %v2238_v51 = vadd.f32 %v3433_v50, %v1946_v38  ;;  %v1569_v38 = vld [vmem:[#allocation2 + $0x218] sm:$0xff] }
0x1350   :  { %v2228_v52 = vpop.f32.mrf.mxu1 }
0x1351   :  { %v2237_v8 = vadd.f32 %v2228_v52, %v1945_v27 }
0x13a7   :  { %v2641_v53 = vpop.xlane.xlu0 %2640 }
0x13a8   :  { %3584 = vrcp.f32 %v2641_v53  ;;  %v3447_v34 = vpop.f32.mrf.mxu1 }
0x13a9   :  { %v2638_v54 = vpop.xlane.xlu1 %2637 }
0x13aa   :  { %3586 = vrcp.f32 %v2638_v54  ;;  %v2438_v55 = vpop.f32.mrf.mxu1 }
0x13ab   :  { %3450 = vmatprep.mubr.msk.f32.mxu1 %vm149_vm1, %v2438_v55  ;;  %v2653_v37 = vpop.permute.xlu0 %2652  ;;  %v1571_v55 = vld [vmem:[#allocation2 + $0x228] sm:$0xff] }
0x13ac   :  { %3451 = vmatmul.mubr.msk.f32.vlgmr.msra.gmra.mxu1 %vm149_vm1, %v3447_v34 }
0x13ad   :  { %v2655_v56 = vpop.permute.xlu1 %2654 }
0x13ae   :  { %3460 = vmatprep.subr.mxu1 %v2655_v56 }
0x13af   :  { %3461 = vmatpush3.msra.mxu1 %v2655_v56 }
0x13b0   :  { %3462 = vmatprep.subr.mxu1 %v2653_v37 }
0x13b1   :  { %3463 = vmatpush3.msra.mxu1 %v2653_v37 }
0x13b2   :  { %3467 = vmatprep.subr.mxu1 %v2739_v6 }
0x13b5   :  { %v3585_v9 = vpop.eup %3584 }
0x13b6   :  { %v2645_v59 = vmul.f32 %v3585_v9, %v2641_v53  ;;  %v1570_v53 = vld [vmem:[#allocation2 + $0x220] sm:$0xff] }
0x13b7   :  { %v3587_v60 = vpop.eup %3586 }
0x13b8   :  { %v2647_v61 = vsub.f32 2.0, %v2645_v59  ;;  %v2644_v62 = vmul.f32 %v3587_v60, %v2638_v54  ;;  %v1554_v59 = vld [vmem:[#allocation2 + $0x1a0] sm:$0xff] }
0x13ba   :  { %v2646_v63 = vsub.f32 2.0, %v2644_v62  ;;  %v2649_v0 = vmul.f32 %v3585_v9, %v2647_v61  ;;  %v1555_v9 = vld [vmem:[#allocation2 + $0x1a8] sm:$0xff]  ;;  %v1552_v61 = vld [vmem:[#allocation2 + $0x190] sm:$0xff]  ;;  %v1565_v62 = vld [vmem:[#allocation2 + $0x1f8] sm:$0xff] }
0x13bc   :  { %v2648_v1 = vmul.f32 %v3587_v60, %v2646_v63  ;;  %v2651_v4 = vmul.f32 %v2649_v0, %v2635_v43  ;;  %v1553_v60 = vld [vmem:[#allocation2 + $0x198] sm:$0xff]  ;;  %v1564_v0 = vld [vmem:[#allocation2 + $0x1f0] sm:$0xff] }
0x13be   :  { %v2650_v3 = vmul.f32 %v2648_v1, %v2634_v46 }
0x13c0   :  { %3464 = vmatprep.mubr.msk.f32.mxu1 %vm233_vm2, %v2650_v3 }
0x13c1   :  { %3465 = vmatmul.mubr.msk.f32.vlgmr.msra.gmra.mxu1 %vm233_vm2, %v2651_v4 }
0x13c2   :  { %3468 = vmatpush3.msra.mxu1 %v2739_v6 }
0x13c3   :  { %3483 = vmatprep.subr.mxu1 %v1559_v40 }
0x146c   :  { %v3452_v7 = vpop.f32.mrf.mxu1 }
0x146d   :  { %v2530_v10 = vadd.f32 %v3452_v7, %v2238_v51  ;;  %v1568_v51 = vld [vmem:[#allocation2 + $0x210] sm:$0xff]  ;;  %v1567_v7 = vld [vmem:[#allocation2 + $0x208] sm:$0xff] }
0x146e   :  { %v2520_v12 = vpop.f32.mrf.mxu1 }
0x146f   :  { %v2529_v13 = vadd.f32 %v2520_v12, %v2237_v8  ;;  %v1566_v12 = vld [vmem:[#allocation2 + $0x200] sm:$0xff] }
0x1481   :  { %v3466_v14 = vpop.f32.mrf.mxu1 }
0x1483   :  { %v2730_v5 = vpop.f32.mrf.mxu1 }
0x1484   :  { %3469 = vmatprep.mubr.msk.f32.mxu1 %vm149_vm1, %v2730_v5 }
0x1485   :  { %3470 = vmatmul.mubr.msk.f32.vlgmr.msra.gmra.mxu1 %vm149_vm1, %v3466_v14 }
0x1486   :  { %3484 = vmatpush3.msra.mxu1 %v1559_v40  ;;  %v1575_v40 = vld [vmem:[#allocation2 + $0x248] sm:$0xff] }
0x1487   :  { %3485 = vmatprep.subr.mxu1 %v1558_v57 }
0x1488   :  { %3486 = vmatpush3.msra.mxu1 %v1558_v57  ;;  %v1572_v57 = vld [vmem:[#allocation2 + $0x230] sm:$0xff] }
0x1489   :  { %3487 = vmatprep.subr.mxu1 %v1557_v58 }
0x148a   :  { %3488 = vmatpush3.msra.mxu1 %v1557_v58 }
0x148b   :  { %3489 = vmatprep.subr.mxu1 %v1556_v41 }
0x148c   :  { %3490 = vmatpush3.msra.mxu1 %v1556_v41 }
0x148d   :  { %3491 = vmatprep.subr.mxu1 %v1555_v9 }
0x148e   :  { %3492 = vmatpush3.msra.mxu1 %v1555_v9 }
0x148f   :  { %3493 = vmatprep.subr.mxu1 %v1554_v59 }
0x1490   :  { %3494 = vmatpush3.msra.mxu1 %v1554_v59 }
0x1491   :  { %3495 = vmatprep.subr.mxu1 %v1553_v60 }
0x1492   :  { %3496 = vmatpush3.msra.mxu1 %v1553_v60 }
0x1493   :  { %3497 = vmatprep.subr.mxu1 %v1552_v61 }
0x1494   :  { %3498 = vmatpush3.msra.mxu1 %v1552_v61 }
0x1545   :  { %v3471_v15 = vpop.f32.mrf.mxu1 }
0x1546   :  { %v2822_v2 = vadd.f32 %v3471_v15, %v2530_v10 }
0x1547   :  { %v2812_v17 = vpop.f32.mrf.mxu1 }
0x1548   :  { %v2821_v18 = vadd.f32 %v2812_v17, %v2529_v13  ;;  %v2824_v19 = vadd.f32 %v2822_v2, %v3810_v33 }
0x154a   :  { %v2828_v20 = vsel %vm61_vm0, %v2824_v19, 0.0  ;;  %v2823_v16 = vadd.f32 %v2821_v18, %v3808_v32  ;;  %v1550_v32 = vld [vmem:[#allocation2 + $0x180] sm:$0xff] }
0x154b   :  { %2829 = vadd.xlane.f32.xlu0 %v2828_v20  ;;  %3474 = vmatprep.subr.mxu0 %v1550_v32 }
0x154c   :  { %v2825_v21 = vsel %vm61_vm0, %v2823_v16, 0.0  ;;  %3475 = vmatpush3.msra.mxu0 %v1550_v32  ;;  %v1573_v32 = vld [vmem:[#allocation2 + $0x238] sm:$0xff] }
0x154d   :  { %2826 = vadd.xlane.f32.xlu1 %v2825_v21  ;;  %3476 = vmatprep.subr.mxu0 %v1549_v39 }
0x154e   :  { %3477 = vmatpush3.msra.mxu0 %v1549_v39 }
0x154f   :  { %3478 = vmatprep.subr.mxu0 %v1548_v11 }
0x1550   :  { %3479 = vmatpush3.msra.mxu0 %v1548_v11 }
0x15d4   :  { %v2830_v22 = vpop.xlane.xlu0 %2829 }
0x15d5   :  { %v2832_v23 = vmul.f32 0.03125, %v2830_v22 }
0x15d6   :  { %v2827_v25 = vpop.xlane.xlu1 %2826 }
0x15d7   :  { %v2834_v26 = vsub.f32 %v2824_v19, %v2832_v23  ;;  %v2831_v28 = vmul.f32 0.03125, %v2827_v25 }
0x15d9   :  { %v2833_v29 = vsub.f32 %v2823_v16, %v2831_v28  ;;  %v2836_v30 = vmul.f32 %v2834_v26, %v2834_v26 }
0x15db   :  { %v2840_v31 = vsel %vm61_vm0, %v2836_v30, 0.0  ;;  %v2835_v35 = vmul.f32 %v2833_v29, %v2833_v29 }
0x15dc   :  { %2841 = vadd.xlane.f32.xlu0 %v2840_v31 }
0x15dd   :  { %v2837_v33 = vsel %vm61_vm0, %v2835_v35, 0.0 }
0x15de   :  { %2838 = vadd.xlane.f32.xlu1 %v2837_v33 }
0x1665   :  { %v2842_v42 = vpop.xlane.xlu0 %2841 }
0x1666   :  { %v2844_v43 = vmul.f32 0.03125, %v2842_v42  ;;  %v1574_v42 = vld [vmem:[#allocation2 + $0x240] sm:$0xff] }
0x1667   :  { %v2839_v44 = vpop.xlane.xlu1 %2838 }
0x1668   :  { %v2846_v45 = vadd.f32 1e-05, %v2844_v43  ;;  %v2843_v46 = vmul.f32 0.03125, %v2839_v44 }
0x166a   :  { %3588 = vrsqrt.f32 %v2846_v45  ;;  %v2845_v47 = vadd.f32 1e-05, %v2843_v46 }
0x166c   :  { %3590 = vrsqrt.f32 %v2845_v47 }
0x1677   :  { %v3589_v48 = vpop.eup %3588 }
0x1678   :  { %v2850_v49 = vmul.f32 %v3589_v48, %v2834_v26 }
0x1679   :  { %v3591_v50 = vpop.eup %3590 }
0x167a   :  { %v2849_v52 = vmul.f32 %v3591_v50, %v2833_v29  ;;  %v2852_v34 = vmul.f32 %v2850_v49, %v1569_v38 }
0x167c   :  { %v2851_v54 = vmul.f32 %v2849_v52, %v1568_v51  ;;  %v2854_v37 = vadd.f32 %v2852_v34, %v1571_v55 }
0x167e   :  { %v2853_v56 = vadd.f32 %v2851_v54, %v1570_v53 }
0x1680   :  { %3480 = vmatprep.mubr.msk.f32.mxu0 %vm61_vm0, %v2853_v56 }
0x1681   :  { %3481 = vmatmul.mubr.msk.f32.vlgmr.msra.gmra.mxu0 %vm61_vm0, %v2854_v37 }
0x1741   :  { %v3482_v63 = vpop.f32.mrf.mxu0 }
0x1742   :  { %v2933_v1 = vadd.f32 %v3482_v63, %v1565_v62 }
0x1743   :  { %v2927_v3 = vpop.f32.mrf.mxu0 }
0x1744   :  { %v2928_v4 = vadd.f32 %v2927_v3, %v1564_v0  ;;  %v2937_v24 = vmax.f32 %v2933_v1, 0.0 }
0x1746   :  { %v2936_v6 = vmax.f32 %v2928_v4, 0.0 }
0x1748   :  { %3499 = vmatprep.mubr.msk.f32.mxu1 %vm1427_vm3, %v2936_v6 }
0x1749   :  { %3500 = vmatmul.mubr.msk.f32.vlgmr.msra.gmra.mxu1 %vm1427_vm3, %v2937_v24 }
0x1809   :  { %v3501_v27 = vpop.f32.mrf.mxu1 }
0x180a   :  { %v3020_v8 = vadd.f32 %v3501_v27, %v2854_v37 }
0x180b   :  { %v3010_v10 = vpop.f32.mrf.mxu1 }
0x180c   :  { %v3019_v13 = vadd.f32 %v3010_v10, %v2853_v56  ;;  %v3022_v14 = vadd.f32 %v3020_v8, %v1567_v7 }
0x180e   :  { %v3026_v5 = vsel %vm61_vm0, %v3022_v14, 0.0  ;;  %v3021_v15 = vadd.f32 %v3019_v13, %v1566_v12 }
0x180f   :  { %3027 = vadd.xlane.f32.xlu0 %v3026_v5 }
0x1810   :  { %v3023_v2 = vsel %vm61_vm0, %v3021_v15, 0.0 }
0x1811   :  { %3024 = vadd.xlane.f32.xlu1 %v3023_v2 }
0x1898   :  { %v3028_v17 = vpop.xlane.xlu0 %3027 }
0x1899   :  { %v3030_v18 = vmul.f32 0.03125, %v3028_v17 }
0x189a   :  { %v3025_v19 = vpop.xlane.xlu1 %3024 }
0x189b   :  { %v3032_v20 = vsub.f32 %v3022_v14, %v3030_v18  ;;  %v3029_v16 = vmul.f32 0.03125, %v3025_v19 }
0x189d   :  { %v3031_v21 = vsub.f32 %v3021_v15, %v3029_v16  ;;  %v3034_v22 = vmul.f32 %v3032_v20, %v3032_v20 }
0x189f   :  { %v3038_v23 = vsel %vm61_vm0, %v3034_v22, 0.0  ;;  %v3033_v25 = vmul.f32 %v3031_v21, %v3031_v21 }
0x18a0   :  { %3039 = vadd.xlane.f32.xlu0 %v3038_v23 }
0x18a1   :  { %v3035_v26 = vsel %vm61_vm0, %v3033_v25, 0.0 }
0x18a2   :  { %3036 = vadd.xlane.f32.xlu1 %v3035_v26 }
0x1929   :  { %v3040_v28 = vpop.xlane.xlu0 %3039 }
0x192a   :  { %v3042_v29 = vmul.f32 0.03125, %v3040_v28 }
0x192b   :  { %v3037_v30 = vpop.xlane.xlu1 %3036 }
0x192c   :  { %v3044_v31 = vadd.f32 1e-05, %v3042_v29  ;;  %v3041_v35 = vmul.f32 0.03125, %v3037_v30 }
0x192e   :  { %3592 = vrsqrt.f32 %v3044_v31  ;;  %v3043_v33 = vadd.f32 1e-05, %v3041_v35 }
0x1930   :  { %3594 = vrsqrt.f32 %v3043_v33 }
0x193b   :  { %v3593_v36 = vpop.eup %3592 }
0x193c   :  { %v3048_v39 = vmul.f32 %v3593_v36, %v3032_v20 }
0x193d   :  { %v3595_v11 = vpop.eup %3594 }
0x193e   :  { %v3050_v58 = vmul.f32 %v3048_v39, %v1573_v32  ;;  %v3047_v41 = vmul.f32 %v3595_v11, %v3031_v21 }
0x1940   :  { %v3052_v43 = vadd.f32 %v3050_v58, %v1575_v40  ;;  %v3049_v44 = vmul.f32 %v3047_v41, %v1572_v57 }
0x1942   :  { %3054 = vst.msk [vmem:[%s3969_s2 + $0x8] sm:$0xff] %vm61_vm0, %v3052_v43  ;;  %v3051_v45 = vadd.f32 %v3049_v44, %v1574_v42 }
0x1944   :  { %3053 = vst.msk [vmem:[%s3969_s2] sm:$0xff] %vm61_vm0, %v3051_v45 }
0x1945   :  { %3059 = vsyncpa [#allocation3], 1 }

</bundles_post_ra>
